<compile_context>
chip_gen: v7x
topology: tpu7x:2x2x1
jax: 0.10.0
libtpu: 0.0.40
codegen_flags: <defaults>
</compile_context>

<pallas_src>
import jax
import jax.numpy as jnp
from jax.experimental import pallas as pl
from jax.experimental.pallas import tpu as pltpu


def make_block_kernel(n_heads: int, dim: int, eps: float = 1e-6):
    head_dim = dim // n_heads
    trans_b = (((1,), (1,)), ((), ()))  # contract last dims: Q @ K^T without a transpose

    def layernorm(v, gamma, beta):
        mu = jnp.mean(v, axis=-1, keepdims=True)
        c = v - mu
        var = jnp.mean(c * c, axis=-1, keepdims=True)
        return c * jax.lax.rsqrt(var + eps) * gamma + beta

    def kernel(x_ref, g1_ref, b1_ref, wqkv_ref, bqkv_ref, wproj_ref, bproj_ref,
               g2_ref, b2_ref, wfc1_ref, bfc1_ref, wfc2_ref, bfc2_ref, o_ref):
        x = x_ref[0].astype(jnp.float32)                                   # (N, D) f32

        # ---------------- norm1 + fused QKV projection (bf16 MXU, f32 acc) ----------------
        h1 = layernorm(x, g1_ref[...], b1_ref[...])                        # (N, D) f32
        # softmax scale is already folded into the Q columns of W_qkv / b_qkv.
        qkv = (jnp.dot(h1.astype(jnp.bfloat16), wqkv_ref[...],
                       preferred_element_type=jnp.float32)
               + bqkv_ref[...]).astype(jnp.bfloat16)                       # (N, 3D) bf16

        # ---------------- per-head attention, results concatenated in-register ------------
        heads_out = []
        for head in range(n_heads):
            c0 = head * head_dim
            q_h = qkv[:, c0:c0 + head_dim]                                 # (N, hd) bf16
            k_h = qkv[:, dim + c0:dim + c0 + head_dim]                     # (N, hd) bf16
            v_h = qkv[:, 2 * dim + c0:2 * dim + c0 + head_dim]             # (N, hd) bf16

            s = jax.lax.dot_general(q_h, k_h, trans_b,
                                    preferred_element_type=jnp.float32)    # (N, N) f32
            m = jnp.max(s, axis=-1, keepdims=True)
            e = jnp.exp(s - m)
            p = e * pl.reciprocal(jnp.sum(e, axis=-1, keepdims=True), approx=True)
            o_h = jnp.dot(p.astype(jnp.bfloat16), v_h,
                          preferred_element_type=jnp.float32)              # (N, hd) f32
            heads_out.append(o_h.astype(jnp.bfloat16))

        attn_out = jnp.concatenate(heads_out, axis=-1)                     # (N, D) bf16

        # ---------------- output projection + residual ----------------
        proj = jnp.dot(attn_out, wproj_ref[...],
                       preferred_element_type=jnp.float32) + bproj_ref[...]
        x1 = x + proj                                                      # (N, D) f32

        # ---------------- norm2 + MLP + residual ----------------
        h2 = layernorm(x1, g2_ref[...], b2_ref[...])
        f1 = jnp.dot(h2.astype(jnp.bfloat16), wfc1_ref[...],
                     preferred_element_type=jnp.float32) + bfc1_ref[...]   # (N, Hid) f32
        # TODO(synk): PyTorch nn.GELU() is the exact erf form; erf has no guaranteed
        # Mosaic lowering, so the tanh approximation is used (max abs deviation ~5e-4).
        g = 0.5 * f1 * (1.0 + jnp.tanh(0.7978845608028654 *
                                       (f1 + 0.044715 * f1 * f1 * f1)))
        f2 = jnp.dot(g.astype(jnp.bfloat16), wfc2_ref[...],
                     preferred_element_type=jnp.float32) + bfc2_ref[...]   # (N, D) f32

        # attn_drop / proj_drop / mlp drop: p = 0.0 -> identity.
        o_ref[0] = (x1 + f2).astype(o_ref.dtype)

    return kernel


def _vmem_limit_bytes():
    # Per-generation VMEM budget: ~7/8 of physical capacity, capped at 112 MiB.
    # v5e/v6e (128 MiB physical) -> 112 MiB; v7x (64 MiB physical) -> 56 MiB.
    try:
        cap = int(pltpu.get_tpu_info().vmem_capacity_bytes)
    except Exception:
        cap = 64 * 1024 * 1024
    return min(cap * 7 // 8, 112 * 1024 * 1024)


def block_forward(x, g1, be1, w_qkv, b_qkv, w_proj, b_proj,
                  g2, be2, w_fc1, b_fc1, w_fc2, b_fc2, n_heads):
    """x: (B, N, D) f32. Weights in PyTorch nn.Linear / nn.LayerNorm convention:
       w_qkv (3D, D), b_qkv (3D,), w_proj (D, D), b_proj (D,),
       w_fc1 (Hid, D), b_fc1 (Hid,), w_fc2 (D, Hid), b_fc2 (D,),
       g*/be* (D,)."""
    B, N, D = x.shape
    Hid = w_fc1.shape[0]
    hd = D // n_heads
    scale = float(hd ** -0.5)
    f32, bf16 = jnp.float32, jnp.bfloat16

    # Weight prep (glue, plain JAX): transpose so the kernel does x @ W, cast to bf16.
    # Fold the softmax scale into the Q slice of the QKV projection (exact:
    # scale*(x@Wq + bq) == x@(scale*Wq) + scale*bq) -> no in-kernel score scaling.
    scale_vec = jnp.concatenate([jnp.full((D,), scale, dtype=f32),
                                 jnp.ones((2 * D,), dtype=f32)])
    wqkv_t = (w_qkv.T.astype(f32) * scale_vec[None, :]).astype(bf16)   # (D, 3D)
    bqkv = (b_qkv.astype(f32) * scale_vec).reshape(1, 3 * D)           # (1, 3D) f32
    wproj_t = w_proj.T.astype(bf16)        # (D, D)
    wfc1_t = w_fc1.T.astype(bf16)          # (D, Hid)
    wfc2_t = w_fc2.T.astype(bf16)          # (Hid, D)

    g1r = g1.reshape(1, D).astype(f32)
    be1r = be1.reshape(1, D).astype(f32)
    g2r = g2.reshape(1, D).astype(f32)
    be2r = be2.reshape(1, D).astype(f32)
    bproj = b_proj.reshape(1, D).astype(f32)
    bfc1 = b_fc1.reshape(1, Hid).astype(f32)
    bfc2 = b_fc2.reshape(1, D).astype(f32)

    kernel = make_block_kernel(n_heads, D)

    # Advisory cost estimate so XLA can schedule neighbouring ops around the call.
    flops = B * (2 * N * (3 * D * D + D * D + 2 * D * Hid) + 4 * n_heads * N * N * hd)
    transcendentals = B * (n_heads * N * N + N * Hid)
    bytes_accessed = 2 * (3 * D * D + D * D + 2 * D * Hid) + B * 2 * N * D * 4
    cost = pl.CostEstimate(flops=flops, transcendentals=transcendentals,
                           bytes_accessed=bytes_accessed)

    def run(single_buffer_consts):
        if single_buffer_consts:
            # Constants never change across the grid: 1 buffer, not 2 (VMEM saver).
            const = lambda shape: pl.BlockSpec(shape, lambda b: (0, 0),
                                               pipeline_mode=pl.Buffered(1))
        else:
            const = lambda shape: pl.BlockSpec(shape, lambda b: (0, 0))
        return pl.pallas_call(
            kernel,
            out_shape=jax.ShapeDtypeStruct((B, N, D), x.dtype),
            grid_spec=pltpu.PrefetchScalarGridSpec(
                num_scalar_prefetch=0,
                grid=(B,),
                in_specs=[
                    pl.BlockSpec((1, N, D), lambda b: (b, 0, 0)),   # x: one sample
                    const((1, D)),            # norm1 gamma
                    const((1, D)),            # norm1 beta
                    const((D, 3 * D)),        # W_qkv^T  (bf16, Q cols pre-scaled)
                    const((1, 3 * D)),        # b_qkv    (Q part pre-scaled)
                    const((D, D)),            # W_proj^T (bf16)
                    const((1, D)),            # b_proj
                    const((1, D)),            # norm2 gamma
                    const((1, D)),            # norm2 beta
                    const((D, Hid)),          # W_fc1^T  (bf16)
                    const((1, Hid)),          # b_fc1
                    const((Hid, D)),          # W_fc2^T  (bf16)
                    const((1, D)),            # b_fc2
                ],
                out_specs=pl.BlockSpec((1, N, D), lambda b: (b, 0, 0)),
            ),
            compiler_params=pltpu.CompilerParams(
                dimension_semantics=("parallel",),
                vmem_limit_bytes=_vmem_limit_bytes(),
            ),
            cost_estimate=cost,
        )(x, g1r, be1r, wqkv_t, bqkv, wproj_t, bproj,
          g2r, be2r, wfc1_t, bfc1, wfc2_t, bfc2)

    try:
        return jax.block_until_ready(run(True))
    except Exception:
        # TODO(synk): this JAX build rejected Buffered(1) single-buffering of the
        # constant weight blocks; fall back to default double buffering.
        return run(False)


def reference_block(x, g1, be1, w_qkv, b_qkv, w_proj, b_proj,
                    g2, be2, w_fc1, b_fc1, w_fc2, b_fc2, n_heads, eps=1e-6):
    """Pure-JAX f32 reference mirroring the PyTorch Block (exact erf GELU)."""
    B, N, D = x.shape
    hd = D // n_heads
    scale = hd ** (-0.5)

    def ln(v, g, b):
        mu = v.mean(axis=-1, keepdims=True)
        var = ((v - mu) ** 2).mean(axis=-1, keepdims=True)
        return (v - mu) / jnp.sqrt(var + eps) * g + b

    h = ln(x, g1, be1)
    qkv = h @ w_qkv.T + b_qkv
    qkv = qkv.reshape(B, N, 3, n_heads, hd).transpose(2, 0, 3, 1, 4)
    q, k, v = qkv[0], qkv[1], qkv[2]
    dp = jnp.einsum('bhqd,bhkd->bhqk', q, k) * scale
    attn = jax.nn.softmax(dp, axis=-1)
    wa = jnp.einsum('bhqk,bhkd->bhqd', attn, v)
    wa = wa.transpose(0, 2, 1, 3).reshape(B, N, D)
    x = x + wa @ w_proj.T + b_proj
    h2 = ln(x, g2, be2)
    hid = jax.nn.gelu(h2 @ w_fc1.T + b_fc1, approximate=False)
    return x + hid @ w_fc2.T + b_fc2


if __name__ == "__main__":
    # Small shapes consistent with the module: batch=2, tokens=8, dim=32, heads=4,
    # mlp hidden = dim * 4 = 128.
    B, N, D, HEADS = 2, 8, 32, 4
    HID = int(D * 4.0)

    key = jax.random.PRNGKey(0)
    ks = jax.random.split(key, 12)

    x = jax.random.normal(ks[0], (B, N, D), dtype=jnp.float32)
    g1 = 1.0 + 0.1 * jax.random.normal(ks[1], (D,), dtype=jnp.float32)
    be1 = 0.05 * jax.random.normal(ks[2], (D,), dtype=jnp.float32)
    w_qkv = 0.05 * jax.random.normal(ks[3], (3 * D, D), dtype=jnp.float32)
    b_qkv = 0.01 * jax.random.normal(ks[4], (3 * D,), dtype=jnp.float32)
    w_proj = 0.05 * jax.random.normal(ks[5], (D, D), dtype=jnp.float32)
    b_proj = 0.01 * jax.random.normal(ks[6], (D,), dtype=jnp.float32)
    g2 = 1.0 + 0.1 * jax.random.normal(ks[7], (D,), dtype=jnp.float32)
    be2 = 0.05 * jax.random.normal(ks[8], (D,), dtype=jnp.float32)
    w_fc1 = 0.05 * jax.random.normal(ks[9], (HID, D), dtype=jnp.float32)
    b_fc1 = 0.01 * jax.random.normal(ks[10], (HID,), dtype=jnp.float32)
    w_fc2 = 0.05 * jax.random.normal(ks[11], (D, HID), dtype=jnp.float32)
    b_fc2 = jnp.zeros((D,), dtype=jnp.float32)

    out = block_forward(x, g1, be1, w_qkv, b_qkv, w_proj, b_proj,
                        g2, be2, w_fc1, b_fc1, w_fc2, b_fc2, n_heads=HEADS)
    out = jax.block_until_ready(out)

    ref = reference_block(x, g1, be1, w_qkv, b_qkv, w_proj, b_proj,
                          g2, be2, w_fc1, b_fc1, w_fc2, b_fc2, n_heads=HEADS)

    assert out.shape == (B, N, D)
    max_err = float(jnp.max(jnp.abs(out - ref)))
    # bf16 MXU inputs + approx reciprocal + tanh GELU => loosened tolerance.
    assert jnp.allclose(out, ref, atol=2e-2, rtol=2e-2), f"mismatch vs reference: {max_err}"

    print("KERNEL_OK")
</pallas_src>

<mosaic_0001>
module attributes {stable_mosaic.version = 11 : i64} {
  func.func @kernel(%arg0: i32, %arg1: memref<1x8x32xf32, #tpu.memory_space<vmem>>, %arg2: memref<1x32xf32, #tpu.memory_space<vmem>>, %arg3: memref<1x32xf32, #tpu.memory_space<vmem>>, %arg4: memref<32x96xbf16, #tpu.memory_space<vmem>>, %arg5: memref<1x96xf32, #tpu.memory_space<vmem>>, %arg6: memref<32x32xbf16, #tpu.memory_space<vmem>>, %arg7: memref<1x32xf32, #tpu.memory_space<vmem>>, %arg8: memref<1x32xf32, #tpu.memory_space<vmem>>, %arg9: memref<1x32xf32, #tpu.memory_space<vmem>>, %arg10: memref<32x128xbf16, #tpu.memory_space<vmem>>, %arg11: memref<1x128xf32, #tpu.memory_space<vmem>>, %arg12: memref<128x32xbf16, #tpu.memory_space<vmem>>, %arg13: memref<1x32xf32, #tpu.memory_space<vmem>>, %arg14: memref<1x8x32xf32, #tpu.memory_space<vmem>>) attributes {dimension_semantics = [#tpu.dimension_semantics<parallel>], iteration_bounds = array<i64: 2>, scalar_prefetch = 0 : i64, scratch_operands = 0 : i64, tpu.core_type = #tpu.core_type<tc>, window_params = [{transform_indices = @transform_0, window_bounds = array<i64: 1, 8, 32>}, {pipeline_mode = #tpu.pipeline_mode<synchronous>, transform_indices = @transform_1, window_bounds = array<i64: 1, 32>}, {pipeline_mode = #tpu.pipeline_mode<synchronous>, transform_indices = @transform_2, window_bounds = array<i64: 1, 32>}, {pipeline_mode = #tpu.pipeline_mode<synchronous>, transform_indices = @transform_3, window_bounds = array<i64: 32, 96>}, {pipeline_mode = #tpu.pipeline_mode<synchronous>, transform_indices = @transform_4, window_bounds = array<i64: 1, 96>}, {pipeline_mode = #tpu.pipeline_mode<synchronous>, transform_indices = @transform_5, window_bounds = array<i64: 32, 32>}, {pipeline_mode = #tpu.pipeline_mode<synchronous>, transform_indices = @transform_6, window_bounds = array<i64: 1, 32>}, {pipeline_mode = #tpu.pipeline_mode<synchronous>, transform_indices = @transform_7, window_bounds = array<i64: 1, 32>}, {pipeline_mode = #tpu.pipeline_mode<synchronous>, transform_indices = @transform_8, window_bounds = array<i64: 1, 32>}, {pipeline_mode = #tpu.pipeline_mode<synchronous>, transform_indices = @transform_9, window_bounds = array<i64: 32, 128>}, {pipeline_mode = #tpu.pipeline_mode<synchronous>, transform_indices = @transform_10, window_bounds = array<i64: 1, 128>}, {pipeline_mode = #tpu.pipeline_mode<synchronous>, transform_indices = @transform_11, window_bounds = array<i64: 128, 32>}, {pipeline_mode = #tpu.pipeline_mode<synchronous>, transform_indices = @transform_12, window_bounds = array<i64: 1, 32>}, {transform_indices = @transform_13, window_bounds = array<i64: 1, 8, 32>}]} {
    %c0 = arith.constant 0 : index
    %c0_0 = arith.constant 0 : index
    %c0_1 = arith.constant 0 : index
    %0 = vector.load %arg1[%c0, %c0_0, %c0_1] : memref<1x8x32xf32, #tpu.memory_space<vmem>>, vector<1x8x32xf32>
    %1 = vector.shape_cast %0 : vector<1x8x32xf32> to vector<8x32xf32>
    %c0_2 = arith.constant 0 : index
    %c0_3 = arith.constant 0 : index
    %2 = vector.load %arg2[%c0_2, %c0_3] : memref<1x32xf32, #tpu.memory_space<vmem>>, vector<1x32xf32>
    %c0_4 = arith.constant 0 : index
    %c0_5 = arith.constant 0 : index
    %3 = vector.load %arg3[%c0_4, %c0_5] : memref<1x32xf32, #tpu.memory_space<vmem>>, vector<1x32xf32>
    %cst = arith.constant dense<0.000000e+00> : vector<8xf32>
    %4 = vector.multi_reduction <add>, %1, %cst [1] : vector<8x32xf32> to vector<8xf32>
    %5 = vector.shape_cast %4 : vector<8xf32> to vector<8x1xf32>
    %cst_6 = arith.constant 3.200000e+01 : f32
    %6 = vector.broadcast %cst_6 : f32 to vector<8x1xf32>
    %7 = arith.divf %5, %6 : vector<8x1xf32>
    %8 = vector.broadcast %7 : vector<8x1xf32> to vector<8x32xf32>
    %9 = arith.subf %1, %8 : vector<8x32xf32>
    %10 = arith.mulf %9, %9 : vector<8x32xf32>
    %cst_7 = arith.constant dense<0.000000e+00> : vector<8xf32>
    %11 = vector.multi_reduction <add>, %10, %cst_7 [1] : vector<8x32xf32> to vector<8xf32>
    %12 = vector.shape_cast %11 : vector<8xf32> to vector<8x1xf32>
    %cst_8 = arith.constant 3.200000e+01 : f32
    %13 = vector.broadcast %cst_8 : f32 to vector<8x1xf32>
    %14 = arith.divf %12, %13 : vector<8x1xf32>
    %cst_9 = arith.constant 9.99999997E-7 : f32
    %15 = vector.broadcast %cst_9 : f32 to vector<8x1xf32>
    %16 = arith.addf %14, %15 : vector<8x1xf32>
    %17 = math.rsqrt %16 : vector<8x1xf32>
    %18 = vector.broadcast %17 : vector<8x1xf32> to vector<8x32xf32>
    %19 = arith.mulf %9, %18 : vector<8x32xf32>
    %20 = vector.broadcast %2 : vector<1x32xf32> to vector<8x32xf32>
    %21 = arith.mulf %19, %20 : vector<8x32xf32>
    %22 = vector.broadcast %3 : vector<1x32xf32> to vector<8x32xf32>
    %23 = arith.addf %21, %22 : vector<8x32xf32>
    %24 = arith.truncf %23 : vector<8x32xf32> to vector<8x32xbf16>
    %c0_10 = arith.constant 0 : index
    %c0_11 = arith.constant 0 : index
    %25 = vector.load %arg4[%c0_10, %c0_11] : memref<32x96xbf16, #tpu.memory_space<vmem>>, vector<32x96xbf16>
    %cst_12 = arith.constant dense<0.000000e+00> : vector<8x96xf32>
    %26 = tpu.matmul %24, %25, %cst_12 {dimension_numbers = #tpu.dot_dimension_numbers<[1], [0], [0], [1], [0, 0, 1, 1], [], []>} : vector<8x32xbf16>, vector<32x96xbf16>, vector<8x96xf32> -> vector<8x96xf32>
    %c0_13 = arith.constant 0 : index
    %c0_14 = arith.constant 0 : index
    %27 = vector.load %arg5[%c0_13, %c0_14] : memref<1x96xf32, #tpu.memory_space<vmem>>, vector<1x96xf32>
    %28 = vector.broadcast %27 : vector<1x96xf32> to vector<8x96xf32>
    %29 = arith.addf %26, %28 : vector<8x96xf32>
    %30 = arith.truncf %29 : vector<8x96xf32> to vector<8x96xbf16>
    %31 = vector.extract_strided_slice %30 {offsets = [0, 0], sizes = [8, 8], strides = [1, 1]} : vector<8x96xbf16> to vector<8x8xbf16>
    %32 = vector.extract_strided_slice %30 {offsets = [0, 32], sizes = [8, 8], strides = [1, 1]} : vector<8x96xbf16> to vector<8x8xbf16>
    %33 = vector.extract_strided_slice %30 {offsets = [0, 64], sizes = [8, 8], strides = [1, 1]} : vector<8x96xbf16> to vector<8x8xbf16>
    %cst_15 = arith.constant dense<0.000000e+00> : vector<8x8xf32>
    %34 = tpu.matmul %31, %32, %cst_15 {dimension_numbers = #tpu.dot_dimension_numbers<[1], [1], [0], [0], [0, 0, 1, 0], [], []>} : vector<8x8xbf16>, vector<8x8xbf16>, vector<8x8xf32> -> vector<8x8xf32>
    %cst_16 = arith.constant dense<0xFF800000> : vector<8xf32>
    %35 = vector.multi_reduction <maximumf>, %34, %cst_16 [1] : vector<8x8xf32> to vector<8xf32>
    %36 = vector.shape_cast %35 : vector<8xf32> to vector<8x1xf32>
    %37 = vector.broadcast %36 : vector<8x1xf32> to vector<8x8xf32>
    %38 = arith.subf %34, %37 : vector<8x8xf32>
    %39 = math.exp %38 : vector<8x8xf32>
    %cst_17 = arith.constant dense<0.000000e+00> : vector<8xf32>
    %40 = vector.multi_reduction <add>, %39, %cst_17 [1] : vector<8x8xf32> to vector<8xf32>
    %41 = vector.shape_cast %40 : vector<8xf32> to vector<8x1xf32>
    %42 = tpu.reciprocal %41 {approx = true} : vector<8x1xf32> -> vector<8x1xf32>
    %43 = vector.broadcast %42 : vector<8x1xf32> to vector<8x8xf32>
    %44 = arith.mulf %39, %43 : vector<8x8xf32>
    %45 = arith.truncf %44 : vector<8x8xf32> to vector<8x8xbf16>
    %cst_18 = arith.constant dense<0.000000e+00> : vector<8x8xf32>
    %46 = tpu.matmul %45, %33, %cst_18 {dimension_numbers = #tpu.dot_dimension_numbers<[1], [0], [0], [1], [0, 0, 1, 1], [], []>} : vector<8x8xbf16>, vector<8x8xbf16>, vector<8x8xf32> -> vector<8x8xf32>
    %47 = arith.truncf %46 : vector<8x8xf32> to vector<8x8xbf16>
    %48 = vector.extract_strided_slice %30 {offsets = [0, 8], sizes = [8, 8], strides = [1, 1]} : vector<8x96xbf16> to vector<8x8xbf16>
    %49 = vector.extract_strided_slice %30 {offsets = [0, 40], sizes = [8, 8], strides = [1, 1]} : vector<8x96xbf16> to vector<8x8xbf16>
    %50 = vector.extract_strided_slice %30 {offsets = [0, 72], sizes = [8, 8], strides = [1, 1]} : vector<8x96xbf16> to vector<8x8xbf16>
    %cst_19 = arith.constant dense<0.000000e+00> : vector<8x8xf32>
    %51 = tpu.matmul %48, %49, %cst_19 {dimension_numbers = #tpu.dot_dimension_numbers<[1], [1], [0], [0], [0, 0, 1, 0], [], []>} : vector<8x8xbf16>, vector<8x8xbf16>, vector<8x8xf32> -> vector<8x8xf32>
    %cst_20 = arith.constant dense<0xFF800000> : vector<8xf32>
    %52 = vector.multi_reduction <maximumf>, %51, %cst_20 [1] : vector<8x8xf32> to vector<8xf32>
    %53 = vector.shape_cast %52 : vector<8xf32> to vector<8x1xf32>
    %54 = vector.broadcast %53 : vector<8x1xf32> to vector<8x8xf32>
    %55 = arith.subf %51, %54 : vector<8x8xf32>
    %56 = math.exp %55 : vector<8x8xf32>
    %cst_21 = arith.constant dense<0.000000e+00> : vector<8xf32>
    %57 = vector.multi_reduction <add>, %56, %cst_21 [1] : vector<8x8xf32> to vector<8xf32>
    %58 = vector.shape_cast %57 : vector<8xf32> to vector<8x1xf32>
    %59 = tpu.reciprocal %58 {approx = true} : vector<8x1xf32> -> vector<8x1xf32>
    %60 = vector.broadcast %59 : vector<8x1xf32> to vector<8x8xf32>
    %61 = arith.mulf %56, %60 : vector<8x8xf32>
    %62 = arith.truncf %61 : vector<8x8xf32> to vector<8x8xbf16>
    %cst_22 = arith.constant dense<0.000000e+00> : vector<8x8xf32>
    %63 = tpu.matmul %62, %50, %cst_22 {dimension_numbers = #tpu.dot_dimension_numbers<[1], [0], [0], [1], [0, 0, 1, 1], [], []>} : vector<8x8xbf16>, vector<8x8xbf16>, vector<8x8xf32> -> vector<8x8xf32>
    %64 = arith.truncf %63 : vector<8x8xf32> to vector<8x8xbf16>
    %65 = vector.extract_strided_slice %30 {offsets = [0, 16], sizes = [8, 8], strides = [1, 1]} : vector<8x96xbf16> to vector<8x8xbf16>
    %66 = vector.extract_strided_slice %30 {offsets = [0, 48], sizes = [8, 8], strides = [1, 1]} : vector<8x96xbf16> to vector<8x8xbf16>
    %67 = vector.extract_strided_slice %30 {offsets = [0, 80], sizes = [8, 8], strides = [1, 1]} : vector<8x96xbf16> to vector<8x8xbf16>
    %cst_23 = arith.constant dense<0.000000e+00> : vector<8x8xf32>
    %68 = tpu.matmul %65, %66, %cst_23 {dimension_numbers = #tpu.dot_dimension_numbers<[1], [1], [0], [0], [0, 0, 1, 0], [], []>} : vector<8x8xbf16>, vector<8x8xbf16>, vector<8x8xf32> -> vector<8x8xf32>
    %cst_24 = arith.constant dense<0xFF800000> : vector<8xf32>
    %69 = vector.multi_reduction <maximumf>, %68, %cst_24 [1] : vector<8x8xf32> to vector<8xf32>
    %70 = vector.shape_cast %69 : vector<8xf32> to vector<8x1xf32>
    %71 = vector.broadcast %70 : vector<8x1xf32> to vector<8x8xf32>
    %72 = arith.subf %68, %71 : vector<8x8xf32>
    %73 = math.exp %72 : vector<8x8xf32>
    %cst_25 = arith.constant dense<0.000000e+00> : vector<8xf32>
    %74 = vector.multi_reduction <add>, %73, %cst_25 [1] : vector<8x8xf32> to vector<8xf32>
    %75 = vector.shape_cast %74 : vector<8xf32> to vector<8x1xf32>
    %76 = tpu.reciprocal %75 {approx = true} : vector<8x1xf32> -> vector<8x1xf32>
    %77 = vector.broadcast %76 : vector<8x1xf32> to vector<8x8xf32>
    %78 = arith.mulf %73, %77 : vector<8x8xf32>
    %79 = arith.truncf %78 : vector<8x8xf32> to vector<8x8xbf16>
    %cst_26 = arith.constant dense<0.000000e+00> : vector<8x8xf32>
    %80 = tpu.matmul %79, %67, %cst_26 {dimension_numbers = #tpu.dot_dimension_numbers<[1], [0], [0], [1], [0, 0, 1, 1], [], []>} : vector<8x8xbf16>, vector<8x8xbf16>, vector<8x8xf32> -> vector<8x8xf32>
    %81 = arith.truncf %80 : vector<8x8xf32> to vector<8x8xbf16>
    %82 = vector.extract_strided_slice %30 {offsets = [0, 24], sizes = [8, 8], strides = [1, 1]} : vector<8x96xbf16> to vector<8x8xbf16>
    %83 = vector.extract_strided_slice %30 {offsets = [0, 56], sizes = [8, 8], strides = [1, 1]} : vector<8x96xbf16> to vector<8x8xbf16>
    %84 = vector.extract_strided_slice %30 {offsets = [0, 88], sizes = [8, 8], strides = [1, 1]} : vector<8x96xbf16> to vector<8x8xbf16>
    %cst_27 = arith.constant dense<0.000000e+00> : vector<8x8xf32>
    %85 = tpu.matmul %82, %83, %cst_27 {dimension_numbers = #tpu.dot_dimension_numbers<[1], [1], [0], [0], [0, 0, 1, 0], [], []>} : vector<8x8xbf16>, vector<8x8xbf16>, vector<8x8xf32> -> vector<8x8xf32>
    %cst_28 = arith.constant dense<0xFF800000> : vector<8xf32>
    %86 = vector.multi_reduction <maximumf>, %85, %cst_28 [1] : vector<8x8xf32> to vector<8xf32>
    %87 = vector.shape_cast %86 : vector<8xf32> to vector<8x1xf32>
    %88 = vector.broadcast %87 : vector<8x1xf32> to vector<8x8xf32>
    %89 = arith.subf %85, %88 : vector<8x8xf32>
    %90 = math.exp %89 : vector<8x8xf32>
    %cst_29 = arith.constant dense<0.000000e+00> : vector<8xf32>
    %91 = vector.multi_reduction <add>, %90, %cst_29 [1] : vector<8x8xf32> to vector<8xf32>
    %92 = vector.shape_cast %91 : vector<8xf32> to vector<8x1xf32>
    %93 = tpu.reciprocal %92 {approx = true} : vector<8x1xf32> -> vector<8x1xf32>
    %94 = vector.broadcast %93 : vector<8x1xf32> to vector<8x8xf32>
    %95 = arith.mulf %90, %94 : vector<8x8xf32>
    %96 = arith.truncf %95 : vector<8x8xf32> to vector<8x8xbf16>
    %cst_30 = arith.constant dense<0.000000e+00> : vector<8x8xf32>
    %97 = tpu.matmul %96, %84, %cst_30 {dimension_numbers = #tpu.dot_dimension_numbers<[1], [0], [0], [1], [0, 0, 1, 1], [], []>} : vector<8x8xbf16>, vector<8x8xbf16>, vector<8x8xf32> -> vector<8x8xf32>
    %98 = arith.truncf %97 : vector<8x8xf32> to vector<8x8xbf16>
    %99 = tpu.concatenate %47, %64, %81, %98 in 1 : vector<8x8xbf16>, vector<8x8xbf16>, vector<8x8xbf16>, vector<8x8xbf16> -> vector<8x32xbf16>
    %c0_31 = arith.constant 0 : index
    %c0_32 = arith.constant 0 : index
    %100 = vector.load %arg6[%c0_31, %c0_32] : memref<32x32xbf16, #tpu.memory_space<vmem>>, vector<32x32xbf16>
    %cst_33 = arith.constant dense<0.000000e+00> : vector<8x32xf32>
    %101 = tpu.matmul %99, %100, %cst_33 {dimension_numbers = #tpu.dot_dimension_numbers<[1], [0], [0], [1], [0, 0, 1, 1], [], []>} : vector<8x32xbf16>, vector<32x32xbf16>, vector<8x32xf32> -> vector<8x32xf32>
    %c0_34 = arith.constant 0 : index
    %c0_35 = arith.constant 0 : index
    %102 = vector.load %arg7[%c0_34, %c0_35] : memref<1x32xf32, #tpu.memory_space<vmem>>, vector<1x32xf32>
    %103 = vector.broadcast %102 : vector<1x32xf32> to vector<8x32xf32>
    %104 = arith.addf %101, %103 : vector<8x32xf32>
    %105 = arith.addf %1, %104 : vector<8x32xf32>
    %c0_36 = arith.constant 0 : index
    %c0_37 = arith.constant 0 : index
    %106 = vector.load %arg8[%c0_36, %c0_37] : memref<1x32xf32, #tpu.memory_space<vmem>>, vector<1x32xf32>
    %c0_38 = arith.constant 0 : index
    %c0_39 = arith.constant 0 : index
    %107 = vector.load %arg9[%c0_38, %c0_39] : memref<1x32xf32, #tpu.memory_space<vmem>>, vector<1x32xf32>
    %cst_40 = arith.constant dense<0.000000e+00> : vector<8xf32>
    %108 = vector.multi_reduction <add>, %105, %cst_40 [1] : vector<8x32xf32> to vector<8xf32>
    %109 = vector.shape_cast %108 : vector<8xf32> to vector<8x1xf32>
    %cst_41 = arith.constant 3.200000e+01 : f32
    %110 = vector.broadcast %cst_41 : f32 to vector<8x1xf32>
    %111 = arith.divf %109, %110 : vector<8x1xf32>
    %112 = vector.broadcast %111 : vector<8x1xf32> to vector<8x32xf32>
    %113 = arith.subf %105, %112 : vector<8x32xf32>
    %114 = arith.mulf %113, %113 : vector<8x32xf32>
    %cst_42 = arith.constant dense<0.000000e+00> : vector<8xf32>
    %115 = vector.multi_reduction <add>, %114, %cst_42 [1] : vector<8x32xf32> to vector<8xf32>
    %116 = vector.shape_cast %115 : vector<8xf32> to vector<8x1xf32>
    %cst_43 = arith.constant 3.200000e+01 : f32
    %117 = vector.broadcast %cst_43 : f32 to vector<8x1xf32>
    %118 = arith.divf %116, %117 : vector<8x1xf32>
    %cst_44 = arith.constant 9.99999997E-7 : f32
    %119 = vector.broadcast %cst_44 : f32 to vector<8x1xf32>
    %120 = arith.addf %118, %119 : vector<8x1xf32>
    %121 = math.rsqrt %120 : vector<8x1xf32>
    %122 = vector.broadcast %121 : vector<8x1xf32> to vector<8x32xf32>
    %123 = arith.mulf %113, %122 : vector<8x32xf32>
    %124 = vector.broadcast %106 : vector<1x32xf32> to vector<8x32xf32>
    %125 = arith.mulf %123, %124 : vector<8x32xf32>
    %126 = vector.broadcast %107 : vector<1x32xf32> to vector<8x32xf32>
    %127 = arith.addf %125, %126 : vector<8x32xf32>
    %128 = arith.truncf %127 : vector<8x32xf32> to vector<8x32xbf16>
    %c0_45 = arith.constant 0 : index
    %c0_46 = arith.constant 0 : index
    %129 = vector.load %arg10[%c0_45, %c0_46] : memref<32x128xbf16, #tpu.memory_space<vmem>>, vector<32x128xbf16>
    %cst_47 = arith.constant dense<0.000000e+00> : vector<8x128xf32>
    %130 = tpu.matmul %128, %129, %cst_47 {dimension_numbers = #tpu.dot_dimension_numbers<[1], [0], [0], [1], [0, 0, 1, 1], [], []>} : vector<8x32xbf16>, vector<32x128xbf16>, vector<8x128xf32> -> vector<8x128xf32>
    %c0_48 = arith.constant 0 : index
    %c0_49 = arith.constant 0 : index
    %131 = vector.load %arg11[%c0_48, %c0_49] : memref<1x128xf32, #tpu.memory_space<vmem>>, vector<1x128xf32>
    %132 = vector.broadcast %131 : vector<1x128xf32> to vector<8x128xf32>
    %133 = arith.addf %130, %132 : vector<8x128xf32>
    %cst_50 = arith.constant 5.000000e-01 : f32
    %134 = vector.broadcast %cst_50 : f32 to vector<8x128xf32>
    %135 = arith.mulf %134, %133 : vector<8x128xf32>
    %cst_51 = arith.constant 4.471500e-02 : f32
    %136 = vector.broadcast %cst_51 : f32 to vector<8x128xf32>
    %137 = arith.mulf %136, %133 : vector<8x128xf32>
    %138 = arith.mulf %137, %133 : vector<8x128xf32>
    %139 = arith.mulf %138, %133 : vector<8x128xf32>
    %140 = arith.addf %133, %139 : vector<8x128xf32>
    %cst_52 = arith.constant 0.797884583 : f32
    %141 = vector.broadcast %cst_52 : f32 to vector<8x128xf32>
    %142 = arith.mulf %141, %140 : vector<8x128xf32>
    %143 = math.tanh %142 : vector<8x128xf32>
    %cst_53 = arith.constant 1.000000e+00 : f32
    %144 = vector.broadcast %cst_53 : f32 to vector<8x128xf32>
    %145 = arith.addf %144, %143 : vector<8x128xf32>
    %146 = arith.mulf %135, %145 : vector<8x128xf32>
    %147 = arith.truncf %146 : vector<8x128xf32> to vector<8x128xbf16>
    %c0_54 = arith.constant 0 : index
    %c0_55 = arith.constant 0 : index
    %148 = vector.load %arg12[%c0_54, %c0_55] : memref<128x32xbf16, #tpu.memory_space<vmem>>, vector<128x32xbf16>
    %cst_56 = arith.constant dense<0.000000e+00> : vector<8x32xf32>
    %149 = tpu.matmul %147, %148, %cst_56 {dimension_numbers = #tpu.dot_dimension_numbers<[1], [0], [0], [1], [0, 0, 1, 1], [], []>} : vector<8x128xbf16>, vector<128x32xbf16>, vector<8x32xf32> -> vector<8x32xf32>
    %c0_57 = arith.constant 0 : index
    %c0_58 = arith.constant 0 : index
    %150 = vector.load %arg13[%c0_57, %c0_58] : memref<1x32xf32, #tpu.memory_space<vmem>>, vector<1x32xf32>
    %151 = vector.broadcast %150 : vector<1x32xf32> to vector<8x32xf32>
    %152 = arith.addf %149, %151 : vector<8x32xf32>
    %153 = arith.addf %105, %152 : vector<8x32xf32>
    %c0_59 = arith.constant 0 : index
    %c0_60 = arith.constant 0 : index
    %c0_61 = arith.constant 0 : index
    %154 = vector.load %arg14[%c0_59, %c0_60, %c0_61] : memref<1x8x32xf32, #tpu.memory_space<vmem>>, vector<1x8x32xf32>
    %155 = vector.shape_cast %154 : vector<1x8x32xf32> to vector<8x32xf32>
    %156 = vector.shape_cast %153 : vector<8x32xf32> to vector<1x8x32xf32>
    tpu.vector_store %arg14[%c0_59, %c0_60, %c0_61], %156 {strides = array<i32>} : memref<1x8x32xf32, #tpu.memory_space<vmem>>, vector<1x8x32xf32>,
    return
  }
  func.func @transform_0(%arg0: i32) -> (i32, i32, i32) {
    %c0_i32 = arith.constant 0 : i32
    %c0_i32_0 = arith.constant 0 : i32
    %c0_i32_1 = arith.constant 0 : i32
    return %arg0, %c0_i32, %c0_i32_0 : i32, i32, i32
  }
  func.func @transform_1(%arg0: i32) -> (i32, i32) {
    %c0_i32 = arith.constant 0 : i32
    %c0_i32_0 = arith.constant 0 : i32
    %c0_i32_1 = arith.constant 0 : i32
    return %c0_i32, %c0_i32_0 : i32, i32
  }
  func.func @transform_2(%arg0: i32) -> (i32, i32) {
    %c0_i32 = arith.constant 0 : i32
    %c0_i32_0 = arith.constant 0 : i32
    %c0_i32_1 = arith.constant 0 : i32
    return %c0_i32, %c0_i32_0 : i32, i32
  }
  func.func @transform_3(%arg0: i32) -> (i32, i32) {
    %c0_i32 = arith.constant 0 : i32
    %c0_i32_0 = arith.constant 0 : i32
    %c0_i32_1 = arith.constant 0 : i32
    return %c0_i32, %c0_i32_0 : i32, i32
  }
  func.func @transform_4(%arg0: i32) -> (i32, i32) {
    %c0_i32 = arith.constant 0 : i32
    %c0_i32_0 = arith.constant 0 : i32
    %c0_i32_1 = arith.constant 0 : i32
    return %c0_i32, %c0_i32_0 : i32, i32
  }
  func.func @transform_5(%arg0: i32) -> (i32, i32) {
    %c0_i32 = arith.constant 0 : i32
    %c0_i32_0 = arith.constant 0 : i32
    %c0_i32_1 = arith.constant 0 : i32
    return %c0_i32, %c0_i32_0 : i32, i32
  }
  func.func @transform_6(%arg0: i32) -> (i32, i32) {
    %c0_i32 = arith.constant 0 : i32
    %c0_i32_0 = arith.constant 0 : i32
    %c0_i32_1 = arith.constant 0 : i32
    return %c0_i32, %c0_i32_0 : i32, i32
  }
  func.func @transform_7(%arg0: i32) -> (i32, i32) {
    %c0_i32 = arith.constant 0 : i32
    %c0_i32_0 = arith.constant 0 : i32
    %c0_i32_1 = arith.constant 0 : i32
    return %c0_i32, %c0_i32_0 : i32, i32
  }
  func.func @transform_8(%arg0: i32) -> (i32, i32) {
    %c0_i32 = arith.constant 0 : i32
    %c0_i32_0 = arith.constant 0 : i32
    %c0_i32_1 = arith.constant 0 : i32
    return %c0_i32, %c0_i32_0 : i32, i32
  }
  func.func @transform_9(%arg0: i32) -> (i32, i32) {
    %c0_i32 = arith.constant 0 : i32
    %c0_i32_0 = arith.constant 0 : i32
    %c0_i32_1 = arith.constant 0 : i32
    return %c0_i32, %c0_i32_0 : i32, i32
  }
  func.func @transform_10(%arg0: i32) -> (i32, i32) {
    %c0_i32 = arith.constant 0 : i32
    %c0_i32_0 = arith.constant 0 : i32
    %c0_i32_1 = arith.constant 0 : i32
    return %c0_i32, %c0_i32_0 : i32, i32
  }
  func.func @transform_11(%arg0: i32) -> (i32, i32) {
    %c0_i32 = arith.constant 0 : i32
    %c0_i32_0 = arith.constant 0 : i32
    %c0_i32_1 = arith.constant 0 : i32
    return %c0_i32, %c0_i32_0 : i32, i32
  }
  func.func @transform_12(%arg0: i32) -> (i32, i32) {
    %c0_i32 = arith.constant 0 : i32
    %c0_i32_0 = arith.constant 0 : i32
    %c0_i32_1 = arith.constant 0 : i32
    return %c0_i32, %c0_i32_0 : i32, i32
  }
  func.func @transform_13(%arg0: i32) -> (i32, i32, i32) {
    %c0_i32 = arith.constant 0 : i32
    %c0_i32_0 = arith.constant 0 : i32
    %c0_i32_1 = arith.constant 0 : i32
    return %arg0, %c0_i32, %c0_i32_0 : i32, i32, i32
  }
}

module attributes {stable_mosaic.version = 11 : i64} {
  func.func @kernel(%arg0: i32, %arg1: memref<1x8x32xf32, #tpu.memory_space<vmem>>, %arg2: memref<1x32xf32, #tpu.memory_space<vmem>>, %arg3: memref<1x32xf32, #tpu.memory_space<vmem>>, %arg4: memref<32x96xbf16, #tpu.memory_space<vmem>>, %arg5: memref<1x96xf32, #tpu.memory_space<vmem>>, %arg6: memref<32x32xbf16, #tpu.memory_space<vmem>>, %arg7: memref<1x32xf32, #tpu.memory_space<vmem>>, %arg8: memref<1x32xf32, #tpu.memory_space<vmem>>, %arg9: memref<1x32xf32, #tpu.memory_space<vmem>>, %arg10: memref<32x128xbf16, #tpu.memory_space<vmem>>, %arg11: memref<1x128xf32, #tpu.memory_space<vmem>>, %arg12: memref<128x32xbf16, #tpu.memory_space<vmem>>, %arg13: memref<1x32xf32, #tpu.memory_space<vmem>>, %arg14: memref<1x8x32xf32, #tpu.memory_space<vmem>>) attributes {dimension_semantics = [#tpu.dimension_semantics<parallel>], iteration_bounds = array<i64: 2>, scalar_prefetch = 0 : i64, scratch_operands = 0 : i64, tpu.core_type = #tpu.core_type<tc>, window_params = [{transform_indices = @transform_0, window_bounds = array<i64: 1, 8, 32>}, {pipeline_mode = #tpu.pipeline_mode<synchronous>, transform_indices = @transform_1, window_bounds = array<i64: 1, 32>}, {pipeline_mode = #tpu.pipeline_mode<synchronous>, transform_indices = @transform_2, window_bounds = array<i64: 1, 32>}, {pipeline_mode = #tpu.pipeline_mode<synchronous>, transform_indices = @transform_3, window_bounds = array<i64: 32, 96>}, {pipeline_mode = #tpu.pipeline_mode<synchronous>, transform_indices = @transform_4, window_bounds = array<i64: 1, 96>}, {pipeline_mode = #tpu.pipeline_mode<synchronous>, transform_indices = @transform_5, window_bounds = array<i64: 32, 32>}, {pipeline_mode = #tpu.pipeline_mode<synchronous>, transform_indices = @transform_6, window_bounds = array<i64: 1, 32>}, {pipeline_mode = #tpu.pipeline_mode<synchronous>, transform_indices = @transform_7, window_bounds = array<i64: 1, 32>}, {pipeline_mode = #tpu.pipeline_mode<synchronous>, transform_indices = @transform_8, window_bounds = array<i64: 1, 32>}, {pipeline_mode = #tpu.pipeline_mode<synchronous>, transform_indices = @transform_9, window_bounds = array<i64: 32, 128>}, {pipeline_mode = #tpu.pipeline_mode<synchronous>, transform_indices = @transform_10, window_bounds = array<i64: 1, 128>}, {pipeline_mode = #tpu.pipeline_mode<synchronous>, transform_indices = @transform_11, window_bounds = array<i64: 128, 32>}, {pipeline_mode = #tpu.pipeline_mode<synchronous>, transform_indices = @transform_12, window_bounds = array<i64: 1, 32>}, {transform_indices = @transform_13, window_bounds = array<i64: 1, 8, 32>}]} {
    %c0 = arith.constant 0 : index
    %c0_0 = arith.constant 0 : index
    %c0_1 = arith.constant 0 : index
    %0 = vector.load %arg1[%c0, %c0_0, %c0_1] : memref<1x8x32xf32, #tpu.memory_space<vmem>>, vector<1x8x32xf32>
    %1 = vector.shape_cast %0 : vector<1x8x32xf32> to vector<8x32xf32>
    %c0_2 = arith.constant 0 : index
    %c0_3 = arith.constant 0 : index
    %2 = vector.load %arg2[%c0_2, %c0_3] : memref<1x32xf32, #tpu.memory_space<vmem>>, vector<1x32xf32>
    %c0_4 = arith.constant 0 : index
    %c0_5 = arith.constant 0 : index
    %3 = vector.load %arg3[%c0_4, %c0_5] : memref<1x32xf32, #tpu.memory_space<vmem>>, vector<1x32xf32>
    %cst = arith.constant dense<0.000000e+00> : vector<8xf32>
    %4 = vector.multi_reduction <add>, %1, %cst [1] : vector<8x32xf32> to vector<8xf32>
    %5 = vector.shape_cast %4 : vector<8xf32> to vector<8x1xf32>
    %cst_6 = arith.constant 3.200000e+01 : f32
    %6 = vector.broadcast %cst_6 : f32 to vector<8x1xf32>
    %7 = arith.divf %5, %6 : vector<8x1xf32>
    %8 = vector.broadcast %7 : vector<8x1xf32> to vector<8x32xf32>
    %9 = arith.subf %1, %8 : vector<8x32xf32>
    %10 = arith.mulf %9, %9 : vector<8x32xf32>
    %cst_7 = arith.constant dense<0.000000e+00> : vector<8xf32>
    %11 = vector.multi_reduction <add>, %10, %cst_7 [1] : vector<8x32xf32> to vector<8xf32>
    %12 = vector.shape_cast %11 : vector<8xf32> to vector<8x1xf32>
    %cst_8 = arith.constant 3.200000e+01 : f32
    %13 = vector.broadcast %cst_8 : f32 to vector<8x1xf32>
    %14 = arith.divf %12, %13 : vector<8x1xf32>
    %cst_9 = arith.constant 9.99999997E-7 : f32
    %15 = vector.broadcast %cst_9 : f32 to vector<8x1xf32>
    %16 = arith.addf %14, %15 : vector<8x1xf32>
    %17 = math.rsqrt %16 : vector<8x1xf32>
    %18 = vector.broadcast %17 : vector<8x1xf32> to vector<8x32xf32>
    %19 = arith.mulf %9, %18 : vector<8x32xf32>
    %20 = vector.broadcast %2 : vector<1x32xf32> to vector<8x32xf32>
    %21 = arith.mulf %19, %20 : vector<8x32xf32>
    %22 = vector.broadcast %3 : vector<1x32xf32> to vector<8x32xf32>
    %23 = arith.addf %21, %22 : vector<8x32xf32>
    %24 = arith.truncf %23 : vector<8x32xf32> to vector<8x32xbf16>
    %c0_10 = arith.constant 0 : index
    %c0_11 = arith.constant 0 : index
    %25 = vector.load %arg4[%c0_10, %c0_11] : memref<32x96xbf16, #tpu.memory_space<vmem>>, vector<32x96xbf16>
    %cst_12 = arith.constant dense<0.000000e+00> : vector<8x96xf32>
    %26 = tpu.matmul %24, %25, %cst_12 {dimension_numbers = #tpu.dot_dimension_numbers<[1], [0], [0], [1], [0, 0, 1, 1], [], []>} : vector<8x32xbf16>, vector<32x96xbf16>, vector<8x96xf32> -> vector<8x96xf32>
    %c0_13 = arith.constant 0 : index
    %c0_14 = arith.constant 0 : index
    %27 = vector.load %arg5[%c0_13, %c0_14] : memref<1x96xf32, #tpu.memory_space<vmem>>, vector<1x96xf32>
    %28 = vector.broadcast %27 : vector<1x96xf32> to vector<8x96xf32>
    %29 = arith.addf %26, %28 : vector<8x96xf32>
    %30 = arith.truncf %29 : vector<8x96xf32> to vector<8x96xbf16>
    %31 = vector.extract_strided_slice %30 {offsets = [0, 0], sizes = [8, 8], strides = [1, 1]} : vector<8x96xbf16> to vector<8x8xbf16>
    %32 = vector.extract_strided_slice %30 {offsets = [0, 32], sizes = [8, 8], strides = [1, 1]} : vector<8x96xbf16> to vector<8x8xbf16>
    %33 = vector.extract_strided_slice %30 {offsets = [0, 64], sizes = [8, 8], strides = [1, 1]} : vector<8x96xbf16> to vector<8x8xbf16>
    %cst_15 = arith.constant dense<0.000000e+00> : vector<8x8xf32>
    %34 = tpu.matmul %31, %32, %cst_15 {dimension_numbers = #tpu.dot_dimension_numbers<[1], [1], [0], [0], [0, 0, 1, 0], [], []>} : vector<8x8xbf16>, vector<8x8xbf16>, vector<8x8xf32> -> vector<8x8xf32>
    %cst_16 = arith.constant dense<0xFF800000> : vector<8xf32>
    %35 = vector.multi_reduction <maximumf>, %34, %cst_16 [1] : vector<8x8xf32> to vector<8xf32>
    %36 = vector.shape_cast %35 : vector<8xf32> to vector<8x1xf32>
    %37 = vector.broadcast %36 : vector<8x1xf32> to vector<8x8xf32>
    %38 = arith.subf %34, %37 : vector<8x8xf32>
    %39 = math.exp %38 : vector<8x8xf32>
    %cst_17 = arith.constant dense<0.000000e+00> : vector<8xf32>
    %40 = vector.multi_reduction <add>, %39, %cst_17 [1] : vector<8x8xf32> to vector<8xf32>
    %41 = vector.shape_cast %40 : vector<8xf32> to vector<8x1xf32>
    %42 = tpu.reciprocal %41 {approx = true} : vector<8x1xf32> -> vector<8x1xf32>
    %43 = vector.broadcast %42 : vector<8x1xf32> to vector<8x8xf32>
    %44 = arith.mulf %39, %43 : vector<8x8xf32>
    %45 = arith.truncf %44 : vector<8x8xf32> to vector<8x8xbf16>
    %cst_18 = arith.constant dense<0.000000e+00> : vector<8x8xf32>
    %46 = tpu.matmul %45, %33, %cst_18 {dimension_numbers = #tpu.dot_dimension_numbers<[1], [0], [0], [1], [0, 0, 1, 1], [], []>} : vector<8x8xbf16>, vector<8x8xbf16>, vector<8x8xf32> -> vector<8x8xf32>
    %47 = arith.truncf %46 : vector<8x8xf32> to vector<8x8xbf16>
    %48 = vector.extract_strided_slice %30 {offsets = [0, 8], sizes = [8, 8], strides = [1, 1]} : vector<8x96xbf16> to vector<8x8xbf16>
    %49 = vector.extract_strided_slice %30 {offsets = [0, 40], sizes = [8, 8], strides = [1, 1]} : vector<8x96xbf16> to vector<8x8xbf16>
    %50 = vector.extract_strided_slice %30 {offsets = [0, 72], sizes = [8, 8], strides = [1, 1]} : vector<8x96xbf16> to vector<8x8xbf16>
    %cst_19 = arith.constant dense<0.000000e+00> : vector<8x8xf32>
    %51 = tpu.matmul %48, %49, %cst_19 {dimension_numbers = #tpu.dot_dimension_numbers<[1], [1], [0], [0], [0, 0, 1, 0], [], []>} : vector<8x8xbf16>, vector<8x8xbf16>, vector<8x8xf32> -> vector<8x8xf32>
    %cst_20 = arith.constant dense<0xFF800000> : vector<8xf32>
    %52 = vector.multi_reduction <maximumf>, %51, %cst_20 [1] : vector<8x8xf32> to vector<8xf32>
    %53 = vector.shape_cast %52 : vector<8xf32> to vector<8x1xf32>
    %54 = vector.broadcast %53 : vector<8x1xf32> to vector<8x8xf32>
    %55 = arith.subf %51, %54 : vector<8x8xf32>
    %56 = math.exp %55 : vector<8x8xf32>
    %cst_21 = arith.constant dense<0.000000e+00> : vector<8xf32>
    %57 = vector.multi_reduction <add>, %56, %cst_21 [1] : vector<8x8xf32> to vector<8xf32>
    %58 = vector.shape_cast %57 : vector<8xf32> to vector<8x1xf32>
    %59 = tpu.reciprocal %58 {approx = true} : vector<8x1xf32> -> vector<8x1xf32>
    %60 = vector.broadcast %59 : vector<8x1xf32> to vector<8x8xf32>
    %61 = arith.mulf %56, %60 : vector<8x8xf32>
    %62 = arith.truncf %61 : vector<8x8xf32> to vector<8x8xbf16>
    %cst_22 = arith.constant dense<0.000000e+00> : vector<8x8xf32>
    %63 = tpu.matmul %62, %50, %cst_22 {dimension_numbers = #tpu.dot_dimension_numbers<[1], [0], [0], [1], [0, 0, 1, 1], [], []>} : vector<8x8xbf16>, vector<8x8xbf16>, vector<8x8xf32> -> vector<8x8xf32>
    %64 = arith.truncf %63 : vector<8x8xf32> to vector<8x8xbf16>
    %65 = vector.extract_strided_slice %30 {offsets = [0, 16], sizes = [8, 8], strides = [1, 1]} : vector<8x96xbf16> to vector<8x8xbf16>
    %66 = vector.extract_strided_slice %30 {offsets = [0, 48], sizes = [8, 8], strides = [1, 1]} : vector<8x96xbf16> to vector<8x8xbf16>
    %67 = vector.extract_strided_slice %30 {offsets = [0, 80], sizes = [8, 8], strides = [1, 1]} : vector<8x96xbf16> to vector<8x8xbf16>
    %cst_23 = arith.constant dense<0.000000e+00> : vector<8x8xf32>
    %68 = tpu.matmul %65, %66, %cst_23 {dimension_numbers = #tpu.dot_dimension_numbers<[1], [1], [0], [0], [0, 0, 1, 0], [], []>} : vector<8x8xbf16>, vector<8x8xbf16>, vector<8x8xf32> -> vector<8x8xf32>
    %cst_24 = arith.constant dense<0xFF800000> : vector<8xf32>
    %69 = vector.multi_reduction <maximumf>, %68, %cst_24 [1] : vector<8x8xf32> to vector<8xf32>
    %70 = vector.shape_cast %69 : vector<8xf32> to vector<8x1xf32>
    %71 = vector.broadcast %70 : vector<8x1xf32> to vector<8x8xf32>
    %72 = arith.subf %68, %71 : vector<8x8xf32>
    %73 = math.exp %72 : vector<8x8xf32>
    %cst_25 = arith.constant dense<0.000000e+00> : vector<8xf32>
    %74 = vector.multi_reduction <add>, %73, %cst_25 [1] : vector<8x8xf32> to vector<8xf32>
    %75 = vector.shape_cast %74 : vector<8xf32> to vector<8x1xf32>
    %76 = tpu.reciprocal %75 {approx = true} : vector<8x1xf32> -> vector<8x1xf32>
    %77 = vector.broadcast %76 : vector<8x1xf32> to vector<8x8xf32>
    %78 = arith.mulf %73, %77 : vector<8x8xf32>
    %79 = arith.truncf %78 : vector<8x8xf32> to vector<8x8xbf16>
    %cst_26 = arith.constant dense<0.000000e+00> : vector<8x8xf32>
    %80 = tpu.matmul %79, %67, %cst_26 {dimension_numbers = #tpu.dot_dimension_numbers<[1], [0], [0], [1], [0, 0, 1, 1], [], []>} : vector<8x8xbf16>, vector<8x8xbf16>, vector<8x8xf32> -> vector<8x8xf32>
    %81 = arith.truncf %80 : vector<8x8xf32> to vector<8x8xbf16>
    %82 = vector.extract_strided_slice %30 {offsets = [0, 24], sizes = [8, 8], strides = [1, 1]} : vector<8x96xbf16> to vector<8x8xbf16>
    %83 = vector.extract_strided_slice %30 {offsets = [0, 56], sizes = [8, 8], strides = [1, 1]} : vector<8x96xbf16> to vector<8x8xbf16>
    %84 = vector.extract_strided_slice %30 {offsets = [0, 88], sizes = [8, 8], strides = [1, 1]} : vector<8x96xbf16> to vector<8x8xbf16>
    %cst_27 = arith.constant dense<0.000000e+00> : vector<8x8xf32>
    %85 = tpu.matmul %82, %83, %cst_27 {dimension_numbers = #tpu.dot_dimension_numbers<[1], [1], [0], [0], [0, 0, 1, 0], [], []>} : vector<8x8xbf16>, vector<8x8xbf16>, vector<8x8xf32> -> vector<8x8xf32>
    %cst_28 = arith.constant dense<0xFF800000> : vector<8xf32>
    %86 = vector.multi_reduction <maximumf>, %85, %cst_28 [1] : vector<8x8xf32> to vector<8xf32>
    %87 = vector.shape_cast %86 : vector<8xf32> to vector<8x1xf32>
    %88 = vector.broadcast %87 : vector<8x1xf32> to vector<8x8xf32>
    %89 = arith.subf %85, %88 : vector<8x8xf32>
    %90 = math.exp %89 : vector<8x8xf32>
    %cst_29 = arith.constant dense<0.000000e+00> : vector<8xf32>
    %91 = vector.multi_reduction <add>, %90, %cst_29 [1] : vector<8x8xf32> to vector<8xf32>
    %92 = vector.shape_cast %91 : vector<8xf32> to vector<8x1xf32>
    %93 = tpu.reciprocal %92 {approx = true} : vector<8x1xf32> -> vector<8x1xf32>
    %94 = vector.broadcast %93 : vector<8x1xf32> to vector<8x8xf32>
    %95 = arith.mulf %90, %94 : vector<8x8xf32>
    %96 = arith.truncf %95 : vector<8x8xf32> to vector<8x8xbf16>
    %cst_30 = arith.constant dense<0.000000e+00> : vector<8x8xf32>
    %97 = tpu.matmul %96, %84, %cst_30 {dimension_numbers = #tpu.dot_dimension_numbers<[1], [0], [0], [1], [0, 0, 1, 1], [], []>} : vector<8x8xbf16>, vector<8x8xbf16>, vector<8x8xf32> -> vector<8x8xf32>
    %98 = arith.truncf %97 : vector<8x8xf32> to vector<8x8xbf16>
    %99 = tpu.concatenate %47, %64, %81, %98 in 1 : vector<8x8xbf16>, vector<8x8xbf16>, vector<8x8xbf16>, vector<8x8xbf16> -> vector<8x32xbf16>
    %c0_31 = arith.constant 0 : index
    %c0_32 = arith.constant 0 : index
    %100 = vector.load %arg6[%c0_31, %c0_32] : memref<32x32xbf16, #tpu.memory_space<vmem>>, vector<32x32xbf16>
    %cst_33 = arith.constant dense<0.000000e+00> : vector<8x32xf32>
    %101 = tpu.matmul %99, %100, %cst_33 {dimension_numbers = #tpu.dot_dimension_numbers<[1], [0], [0], [1], [0, 0, 1, 1], [], []>} : vector<8x32xbf16>, vector<32x32xbf16>, vector<8x32xf32> -> vector<8x32xf32>
    %c0_34 = arith.constant 0 : index
    %c0_35 = arith.constant 0 : index
    %102 = vector.load %arg7[%c0_34, %c0_35] : memref<1x32xf32, #tpu.memory_space<vmem>>, vector<1x32xf32>
    %103 = vector.broadcast %102 : vector<1x32xf32> to vector<8x32xf32>
    %104 = arith.addf %101, %103 : vector<8x32xf32>
    %105 = arith.addf %1, %104 : vector<8x32xf32>
    %c0_36 = arith.constant 0 : index
    %c0_37 = arith.constant 0 : index
    %106 = vector.load %arg8[%c0_36, %c0_37] : memref<1x32xf32, #tpu.memory_space<vmem>>, vector<1x32xf32>
    %c0_38 = arith.constant 0 : index
    %c0_39 = arith.constant 0 : index
    %107 = vector.load %arg9[%c0_38, %c0_39] : memref<1x32xf32, #tpu.memory_space<vmem>>, vector<1x32xf32>
    %cst_40 = arith.constant dense<0.000000e+00> : vector<8xf32>
    %108 = vector.multi_reduction <add>, %105, %cst_40 [1] : vector<8x32xf32> to vector<8xf32>
    %109 = vector.shape_cast %108 : vector<8xf32> to vector<8x1xf32>
    %cst_41 = arith.constant 3.200000e+01 : f32
    %110 = vector.broadcast %cst_41 : f32 to vector<8x1xf32>
    %111 = arith.divf %109, %110 : vector<8x1xf32>
    %112 = vector.broadcast %111 : vector<8x1xf32> to vector<8x32xf32>
    %113 = arith.subf %105, %112 : vector<8x32xf32>
    %114 = arith.mulf %113, %113 : vector<8x32xf32>
    %cst_42 = arith.constant dense<0.000000e+00> : vector<8xf32>
    %115 = vector.multi_reduction <add>, %114, %cst_42 [1] : vector<8x32xf32> to vector<8xf32>
    %116 = vector.shape_cast %115 : vector<8xf32> to vector<8x1xf32>
    %cst_43 = arith.constant 3.200000e+01 : f32
    %117 = vector.broadcast %cst_43 : f32 to vector<8x1xf32>
    %118 = arith.divf %116, %117 : vector<8x1xf32>
    %cst_44 = arith.constant 9.99999997E-7 : f32
    %119 = vector.broadcast %cst_44 : f32 to vector<8x1xf32>
    %120 = arith.addf %118, %119 : vector<8x1xf32>
    %121 = math.rsqrt %120 : vector<8x1xf32>
    %122 = vector.broadcast %121 : vector<8x1xf32> to vector<8x32xf32>
    %123 = arith.mulf %113, %122 : vector<8x32xf32>
    %124 = vector.broadcast %106 : vector<1x32xf32> to vector<8x32xf32>
    %125 = arith.mulf %123, %124 : vector<8x32xf32>
    %126 = vector.broadcast %107 : vector<1x32xf32> to vector<8x32xf32>
    %127 = arith.addf %125, %126 : vector<8x32xf32>
    %128 = arith.truncf %127 : vector<8x32xf32> to vector<8x32xbf16>
    %c0_45 = arith.constant 0 : index
    %c0_46 = arith.constant 0 : index
    %129 = vector.load %arg10[%c0_45, %c0_46] : memref<32x128xbf16, #tpu.memory_space<vmem>>, vector<32x128xbf16>
    %cst_47 = arith.constant dense<0.000000e+00> : vector<8x128xf32>
    %130 = tpu.matmul %128, %129, %cst_47 {dimension_numbers = #tpu.dot_dimension_numbers<[1], [0], [0], [1], [0, 0, 1, 1], [], []>} : vector<8x32xbf16>, vector<32x128xbf16>, vector<8x128xf32> -> vector<8x128xf32>
    %c0_48 = arith.constant 0 : index
    %c0_49 = arith.constant 0 : index
    %131 = vector.load %arg11[%c0_48, %c0_49] : memref<1x128xf32, #tpu.memory_space<vmem>>, vector<1x128xf32>
    %132 = vector.broadcast %131 : vector<1x128xf32> to vector<8x128xf32>
    %133 = arith.addf %130, %132 : vector<8x128xf32>
    %cst_50 = arith.constant 5.000000e-01 : f32
    %134 = vector.broadcast %cst_50 : f32 to vector<8x128xf32>
    %135 = arith.mulf %134, %133 : vector<8x128xf32>
    %cst_51 = arith.constant 4.471500e-02 : f32
    %136 = vector.broadcast %cst_51 : f32 to vector<8x128xf32>
    %137 = arith.mulf %136, %133 : vector<8x128xf32>
    %138 = arith.mulf %137, %133 : vector<8x128xf32>
    %139 = arith.mulf %138, %133 : vector<8x128xf32>
    %140 = arith.addf %133, %139 : vector<8x128xf32>
    %cst_52 = arith.constant 0.797884583 : f32
    %141 = vector.broadcast %cst_52 : f32 to vector<8x128xf32>
    %142 = arith.mulf %141, %140 : vector<8x128xf32>
    %143 = math.tanh %142 : vector<8x128xf32>
    %cst_53 = arith.constant 1.000000e+00 : f32
    %144 = vector.broadcast %cst_53 : f32 to vector<8x128xf32>
    %145 = arith.addf %144, %143 : vector<8x128xf32>
    %146 = arith.mulf %135, %145 : vector<8x128xf32>
    %147 = arith.truncf %146 : vector<8x128xf32> to vector<8x128xbf16>
    %c0_54 = arith.constant 0 : index
    %c0_55 = arith.constant 0 : index
    %148 = vector.load %arg12[%c0_54, %c0_55] : memref<128x32xbf16, #tpu.memory_space<vmem>>, vector<128x32xbf16>
    %cst_56 = arith.constant dense<0.000000e+00> : vector<8x32xf32>
    %149 = tpu.matmul %147, %148, %cst_56 {dimension_numbers = #tpu.dot_dimension_numbers<[1], [0], [0], [1], [0, 0, 1, 1], [], []>} : vector<8x128xbf16>, vector<128x32xbf16>, vector<8x32xf32> -> vector<8x32xf32>
    %c0_57 = arith.constant 0 : index
    %c0_58 = arith.constant 0 : index
    %150 = vector.load %arg13[%c0_57, %c0_58] : memref<1x32xf32, #tpu.memory_space<vmem>>, vector<1x32xf32>
    %151 = vector.broadcast %150 : vector<1x32xf32> to vector<8x32xf32>
    %152 = arith.addf %149, %151 : vector<8x32xf32>
    %153 = arith.addf %105, %152 : vector<8x32xf32>
    %c0_59 = arith.constant 0 : index
    %c0_60 = arith.constant 0 : index
    %c0_61 = arith.constant 0 : index
    %154 = vector.load %arg14[%c0_59, %c0_60, %c0_61] : memref<1x8x32xf32, #tpu.memory_space<vmem>>, vector<1x8x32xf32>
    %155 = vector.shape_cast %154 : vector<1x8x32xf32> to vector<8x32xf32>
    %156 = vector.shape_cast %153 : vector<8x32xf32> to vector<1x8x32xf32>
    tpu.vector_store %arg14[%c0_59, %c0_60, %c0_61], %156 {strides = array<i32>} : memref<1x8x32xf32, #tpu.memory_space<vmem>>, vector<1x8x32xf32>,
    return
  }
  func.func @transform_0(%arg0: i32) -> (i32, i32, i32) {
    %c0_i32 = arith.constant 0 : i32
    %c0_i32_0 = arith.constant 0 : i32
    %c0_i32_1 = arith.constant 0 : i32
    return %arg0, %c0_i32, %c0_i32_0 : i32, i32, i32
  }
  func.func @transform_1(%arg0: i32) -> (i32, i32) {
    %c0_i32 = arith.constant 0 : i32
    %c0_i32_0 = arith.constant 0 : i32
    %c0_i32_1 = arith.constant 0 : i32
    return %c0_i32, %c0_i32_0 : i32, i32
  }
  func.func @transform_2(%arg0: i32) -> (i32, i32) {
    %c0_i32 = arith.constant 0 : i32
    %c0_i32_0 = arith.constant 0 : i32
    %c0_i32_1 = arith.constant 0 : i32
    return %c0_i32, %c0_i32_0 : i32, i32
  }
  func.func @transform_3(%arg0: i32) -> (i32, i32) {
    %c0_i32 = arith.constant 0 : i32
    %c0_i32_0 = arith.constant 0 : i32
    %c0_i32_1 = arith.constant 0 : i32
    return %c0_i32, %c0_i32_0 : i32, i32
  }
  func.func @transform_4(%arg0: i32) -> (i32, i32) {
    %c0_i32 = arith.constant 0 : i32
    %c0_i32_0 = arith.constant 0 : i32
    %c0_i32_1 = arith.constant 0 : i32
    return %c0_i32, %c0_i32_0 : i32, i32
  }
  func.func @transform_5(%arg0: i32) -> (i32, i32) {
    %c0_i32 = arith.constant 0 : i32
    %c0_i32_0 = arith.constant 0 : i32
    %c0_i32_1 = arith.constant 0 : i32
    return %c0_i32, %c0_i32_0 : i32, i32
  }
  func.func @transform_6(%arg0: i32) -> (i32, i32) {
    %c0_i32 = arith.constant 0 : i32
    %c0_i32_0 = arith.constant 0 : i32
    %c0_i32_1 = arith.constant 0 : i32
    return %c0_i32, %c0_i32_0 : i32, i32
  }
  func.func @transform_7(%arg0: i32) -> (i32, i32) {
    %c0_i32 = arith.constant 0 : i32
    %c0_i32_0 = arith.constant 0 : i32
    %c0_i32_1 = arith.constant 0 : i32
    return %c0_i32, %c0_i32_0 : i32, i32
  }
  func.func @transform_8(%arg0: i32) -> (i32, i32) {
    %c0_i32 = arith.constant 0 : i32
    %c0_i32_0 = arith.constant 0 : i32
    %c0_i32_1 = arith.constant 0 : i32
    return %c0_i32, %c0_i32_0 : i32, i32
  }
  func.func @transform_9(%arg0: i32) -> (i32, i32) {
    %c0_i32 = arith.constant 0 : i32
    %c0_i32_0 = arith.constant 0 : i32
    %c0_i32_1 = arith.constant 0 : i32
    return %c0_i32, %c0_i32_0 : i32, i32
  }
  func.func @transform_10(%arg0: i32) -> (i32, i32) {
    %c0_i32 = arith.constant 0 : i32
    %c0_i32_0 = arith.constant 0 : i32
    %c0_i32_1 = arith.constant 0 : i32
    return %c0_i32, %c0_i32_0 : i32, i32
  }
  func.func @transform_11(%arg0: i32) -> (i32, i32) {
    %c0_i32 = arith.constant 0 : i32
    %c0_i32_0 = arith.constant 0 : i32
    %c0_i32_1 = arith.constant 0 : i32
    return %c0_i32, %c0_i32_0 : i32, i32
  }
  func.func @transform_12(%arg0: i32) -> (i32, i32) {
    %c0_i32 = arith.constant 0 : i32
    %c0_i32_0 = arith.constant 0 : i32
    %c0_i32_1 = arith.constant 0 : i32
    return %c0_i32, %c0_i32_0 : i32, i32
  }
  func.func @transform_13(%arg0: i32) -> (i32, i32, i32) {
    %c0_i32 = arith.constant 0 : i32
    %c0_i32_0 = arith.constant 0 : i32
    %c0_i32_1 = arith.constant 0 : i32
    return %arg0, %c0_i32, %c0_i32_0 : i32, i32, i32
  }
}

</mosaic_0001>

<bundles_post_ra>
// kernel: tpu_custom_call.1
= control target key start
LH: loop header
LB: loop body
LE: loop exit
PB: predicated region body
PF: predicated region fallthrough
CT: control target
= control target key end

     0   :  { %s2038_s0 = inlined_call_operand.vmem [shape: f32[2,8,32], index: 0, kind: input, shape index: {}]   ;;  %s2039_s1 = inlined_call_operand.vmem [shape: f32[1,32], index: 1, kind: input, shape index: {}]   ;;  %s2040_s2 = inlined_call_operand.vmem [shape: f32[1,32], index: 2, kind: input, shape index: {}]   ;;  %s2041_s3 = inlined_call_operand.vmem [shape: bf16[32,96], index: 3, kind: input, shape index: {}]   ;;  %s2042_s4 = inlined_call_operand.vmem [shape: f32[1,96], index: 4, kind: input, shape index: {}]   ;;  %s2043_s5 = inlined_call_operand.vmem [shape: bf16[32,32], index: 5, kind: input, shape index: {}]   ;;  %s2044_s6 = inlined_call_operand.vmem [shape: f32[1,32], index: 6, kind: input, shape index: {}]   ;;  %s2045_s7 = inlined_call_operand.vmem [shape: f32[1,32], index: 7, kind: input, shape index: {}]   ;;  %s2046_s8 = inlined_call_operand.vmem [shape: f32[1,32], index: 8, kind: input, shape index: {}]   ;;  %s2047_s9 = inlined_call_operand.vmem [shape: bf16[32,128], index: 9, kind: input, shape index: {}]   ;;  %s2048_s10 = inlined_call_operand.vmem [shape: f32[1,128], index: 10, kind: input, shape index: {}]   ;;  %s2049_s11 = inlined_call_operand.vmem [shape: bf16[128,32], index: 11, kind: input, shape index: {}]   ;;  %s2050_s12 = inlined_call_operand.vmem [shape: f32[1,32], index: 12, kind: input, shape index: {}]   ;;  %s2051_s13 = inlined_call_operand.hbm [shape: f32[2,8,32], index: 13, kind: output, shape index: {}]  }
   0x1   :  { %2052 = sst [smem:[#allocation5_spill]] %s2038_s0 }
   0x2   :  { %2053 = sst [smem:[#allocation6_spill]] %s2039_s1 }
   0x3   :  { %2054 = sst [smem:[#allocation7_spill]] %s2040_s2 }
   0x4   :  { %18 = vsyncpa [#allocation3], 0 }
   0x5   :  { %20 = vsyncpa [#allocation3 + $0x1], 0  ;;  %s1769_s25 = smov 0   ;;  %s1771_s26 = smov 0  }
   0x6   :  { %s1773_s27 = smov 0   ;;  %s1775_s28 = smov 0  }
   0x7 LB: > { %s1790_s29 = sadd.s32 4294967295, %s1680_s28   ;;  %s1358_s30 = sadd.s32 4294967294, %s1680_s28   ;;  %s1680_s28 = sphi %s1775_s28, %s2063_s28   ;;  %s1676_s27 = sphi %s1773_s27, %s2062_s27   ;;  %s1672_s26 = sphi %s1771_s26, %s2061_s26   ;;  %s1668_s25 = sphi %s1769_s25, %s2060_s25  }
   0x8   : > { %s1794_s14 = sadd.s32 1, %s1680_s28   ;;  %s311_s15 = sadd.s32 1, %s1676_s27 }
   0x9   : > { %s308_s16 = ssub.s32 %s1680_s28, %s1794_s14  ;;  %p321_p0 = scmp.ne.s32.totalorder %s1676_s27, %s1672_s26 }
   0xa   : > { %p309_p1 = scmp.eq.s32.totalorder %s308_s16, 0  ;;  %p322_p2 = scmp.eq.s32.totalorder %s1790_s29, 1 }
   0xb   : > { %p327_p3 = scmp.ne.s32.totalorder %s1672_s26, %s1668_s25  ;;  %p328_p4 = scmp.eq.s32.totalorder %s1358_s30, 1 }
   0xc   : > { %s1805_s17 = scalar_select %p309_p1, %s1676_s27, %s311_s15  }
   0xd   : > { %p1807_p5 = por %p322_p2, %p321_p0  ;;  %p1811_p6 = por %p328_p4, %p327_p3 }
   0xe   : > { %p1361_p7 = scmp.ge.s32.totalorder %s1680_s28, 1  ;;  %p389_p8 = scmp.lt.s32.totalorder %s1680_s28, 3 }
  0x10   : > { %p390_p9 = pnand %p1361_p7, %p389_p8 }
  0x11   : > { %p432_p10 = scmp.lt.s32.totalorder (!%p390_p9), %s1790_s29, 1  ;;  %vm440_vm0 = vcmask (!%p390_p9), 261120   ;;  %s2057_s0 = sld [smem:[#allocation5_spill]] (!%p390_p9)  ;;  %v1582_v7 = vld [vmem:[%s2041_s3] sm:$0xff] (!%p390_p9)   ;;  %v1682_v8 = vmov (!%p390_p9), 0.0   ;;  %vm1683_vm1 = vmmov (!%p390_p9), 0  }
  0x12   : > { %393 = sbr.rel (%p390_p9) target bundleno = 2605 (0xa2d), region = 72  ;;  %1435 = vmatprep.subr.bf16.mxu0 (!%p390_p9), %v1682_v8  ;;  %1439 = vmatprep.mubr.msk.bf16.mxu0 (!%p390_p9), %vm1683_vm1, %v1682_v8  ;;  %v1583_v9 = vld [vmem:[%s2041_s3 + $0x8] sm:$0xff] (!%p390_p9)   ;;  %s2058_s1 = sld [smem:[#allocation6_spill]] (!%p390_p9)  ;;  %v1366_v20 = vld [vmem:[%s2042_s4] ss:$0 sm:$0xff] (!%p390_p9)  ;;  %vm540_vm2 = vcmask (!%p390_p9), 64512  }
  0x13   : > { %1436 = vmatpush3.bf16.msra.mxu0 (!%p390_p9), %v1582_v7  ;;  %1455 = vmatprep.subr.bf16.mxu1 (!%p390_p9), %v1682_v8  ;;  %s2059_s2 = sld [smem:[#allocation7_spill]] (!%p390_p9)  ;;  %s1684_s16 = smov (!%p390_p9), 120   ;;  %vm604_vm3 = vcmask (!%p390_p9), 1043456   ;;  %vm994_vm4 = vcmask (!%p390_p9), 130048   ;;  %vm997_vm5 = vcmask (!%p390_p9), 195584  }
  0x14   : > { %1437 = vmatprep.subr.bf16.mxu0 (!%p390_p9), %v1682_v8  ;;  %1457 = vmatprep.mubr.msk.bf16.mxu1 (!%p390_p9), %vm1683_vm1, %v1682_v8  ;;  %s1687_s22 = smov (!%p390_p9), 80   ;;  %s1688_s23 = smov (!%p390_p9), 112  }
  0x15   : > { %s1690_s30 = smov (!%p390_p9), 104   ;;  %s1691_s15 = smov (!%p390_p9), 64  }
  0x17   : > { %1438 = vmatpush3.bf16.msra.mxu0 (!%p390_p9), %v1583_v9 }
  0x18   : > { %1443 = vmatprep.subr.bf16.mxu0 (!%p390_p9), %v1682_v8  ;;  %v1364_v14 = vld [vmem:[%s2058_s1] ss:$0 sm:$0xff] (!%p390_p9) }
  0x19   : > { %s433_s20 = scalar_select %p432_p10, %s1790_s29, 1  ;;  %v1365_v16 = vld [vmem:[%s2059_s2] ss:$0 sm:$0xff] }
  0x1b   : > { %s1363_s21 = sshll.u32 %s433_s20, 3  ;;  %s1685_s20 = smov 96  }
  0x1c   : > { %s435_s24 = scalar_lea.vmem %s2057_s0, %s1363_s21  ;;  %s1686_s21 = smov 88  }
  0x1d   : > { %v1822_v0 = vld [vmem:[%s435_s24] sm:$0xff]  ;;  %s1689_s24 = smov 72  }
  0x1e   : > { %v441_v1 = vsel %vm440_vm0, %v1822_v0, 0.0 }
  0x1f   : > { %442 = vadd.xlane.f32.xlu0 %v441_v1 }
  0xac   : > { %v443_v2 = vpop.xlane.xlu0 %442 }
  0xad   : > { %v445_v3 = vmul.f32 0.03125, %v443_v2 }
  0xaf   : > { %v446_v4 = vsub.f32 %v1822_v0, %v445_v3 }
  0xb1   : > { %v447_v5 = vmul.f32 %v446_v4, %v446_v4 }
  0xb3   : > { %v448_v6 = vsel %vm440_vm0, %v447_v5, 0.0 }
  0xb4   : > { %449 = vadd.xlane.f32.xlu0 %v448_v6 }
 0x141   : > { %v450_v10 = vpop.xlane.xlu0 %449 }
 0x142   : > { %v451_v11 = vmul.f32 0.03125, %v450_v10 }
 0x144   : > { %v452_v12 = vadd.f32 1e-06, %v451_v11 }
 0x146   : > { %1596 = vrsqrt.f32 %v452_v12 }
 0x150   : > { %v1597_v13 = vpop.eup %1596 }
 0x151   : > { %v454_v15 = vmul.f32 %v1597_v13, %v446_v4 }
 0x153   : > { %v461_v17 = vmul.f32 %v1364_v14, %v454_v15 }
 0x155   : > { %v468_v18 = vadd.f32 %v1365_v16, %v461_v17 }
 0x157   : > { %v469_v19 = vpack.c.bf16 %v468_v18, %v468_v18 }
 0x159   : > { %1440 = vmatmul.mubr.msk.bf16.vlgmr.msra.gmra.mrb[0].mxu0 %vm440_vm0, %v469_v19 }
 0x15a   : > { %1445 = vmatprep.mubr.msk.bf16.mxu0 %vm1683_vm1, %v1682_v8 }
 0x22c   : > { %v530_v21 = vpop.f32.mrb[0].mxu0 }
 0x22d   : > { %v531_v22 = vadd.f32 %v1366_v20, %v530_v21  ;;  %v1441_v23 = vpop.f32.mrb[1].mxu0 }
 0x22e   : > { %v533_v24 = vpop.f32.mrb[2].mxu0 }
 0x22f   : > { %v1854_v25 = vpack.c.bf16 %v531_v22, %v531_v22  ;;  %v1442_v26 = vpop.f32.mrb[3].mxu0 }
 0x231   : > { %649 = vrot.lane.b32.xlu0 %v1854_v25, %s1684_s16  ;;  %538 = vrot.lane.b32.xlu1 %v1854_v25, %s1685_s20  ;;  %s1692_s16 = smov 56   ;;  %s1693_s20 = smov 48  }
 0x235   : > { %651 = vrot.lane.b32.xlu1 %v1854_v25, %s1686_s21  ;;  %s1694_s21 = smov 40  }
 0x239   : > { %762 = vrot.lane.b32.xlu1 %v1854_v25, %s1687_s22  ;;  %s1695_s22 = smov 8  }
 0x23d   : > { %760 = vrot.lane.b32.xlu1 %v1854_v25, %s1688_s23 }
 0x241   : > { %873 = vrot.lane.b32.xlu1 %v1854_v25, %s1689_s24 }
 0x245   : > { %871 = vrot.lane.b32.xlu1 %v1854_v25, %s1690_s30  ;;  %s429_s30 = sand.u32 1, %s1672_s26  }
 0x2a3   : > { %v539_v27 = vpop.permute.xlu1 %538  ;;  %v650_v32 = vpop.permute.xlu0 %649 }
 0x2a4   : > { %v545_v28 = vsel %vm540_vm2, %v539_v27, 0 }
 0x2a5   : > { %1444 = vmatpush3.bf16.xpose.msra.mxu0 %v545_v28 }
 0x2a6   : > { %1449 = vmatprep.subr.bf16.mxu0 %v1682_v8 }
 0x2a7   : > { %v652_v29 = vpop.permute.xlu1 %651 }
 0x2a8   : > { %v657_v30 = vsel %vm540_vm2, %v652_v29, 0 }
 0x2a9   : > { %1456 = vmatpush3.bf16.xpose.msra.mxu1 %v657_v30 }
 0x2aa   : > { %1467 = vmatprep.subr.bf16.mxu1 %v1682_v8 }
 0x2ab   : > { %v763_v31 = vpop.permute.xlu1 %762 }
 0x2ac   : > { %1446 = vmatmul.mubr.msk.bf16.vlgmr.msra.gmra.mrb[4].mxu0 %vm540_vm2, %v1854_v25  ;;  %v768_v34 = vsel %vm540_vm2, %v763_v31, 0 }
 0x2ad   : > { %1451 = vmatprep.mubr.msk.bf16.mxu0 %vm1683_vm1, %v1682_v8 }
 0x2af   : > { %v761_v33 = vpop.permute.xlu1 %760 }
 0x2b0   : > { %1458 = vmatmul.mubr.msk.bf16.vlgmr.msra.gmra.mrb[0].mxu1 %vm540_vm2, %v650_v32 }
 0x2b1   : > { %1468 = vmatpush3.bf16.xpose.msra.mxu1 %v768_v34  ;;  %1469 = vmatprep.mubr.msk.bf16.mxu1 %vm1683_vm1, %v1682_v8 }
 0x2b2   : > { %1479 = vmatprep.subr.bf16.mxu1 %v1682_v8 }
 0x2b3   : > { %v874_v35 = vpop.permute.xlu1 %873 }
 0x2b4   : > { %v879_v36 = vsel %vm540_vm2, %v874_v35, 0 }
 0x2b7   : > { %v872_v37 = vpop.permute.xlu1 %871 }
 0x2b8   : > { %1470 = vmatmul.mubr.msk.bf16.vlgmr.msra.gmra.mrb[4].mxu1 %vm540_vm2, %v761_v33 }
 0x2b9   : > { %1480 = vmatpush3.bf16.xpose.msra.mxu1 %v879_v36  ;;  %1481 = vmatprep.mubr.msk.bf16.mxu1 %vm1683_vm1, %v1682_v8 }
 0x2ba   : > { %1491 = vmatprep.subr.bf16.mxu1 %v1682_v8 }
 0x2c0   : > { %1482 = vmatmul.mubr.msk.bf16.vlgmr.msra.gmra.mrb[8].mxu1 %vm540_vm2, %v872_v37 }
 0x2c1   : > { %1495 = vmatprep.mubr.msk.bf16.mxu1 %vm1683_vm1, %v1682_v8 }
 0x37f   : > { %v581_v38 = vpop.f32.mrb[4].mxu0 }
 0x380   : > { %v1447_v39 = vpop.f32.mrb[5].mxu0  ;;  %v587_v40 = vsel %vm540_vm2, %v581_v38, -inf }
 0x381   : > { %588 = vmax.xlane.f32.xlu1 %v587_v40  ;;  %v584_v41 = vpop.f32.mrb[6].mxu0 }
 0x382   : > { %v1448_v42 = vpop.f32.mrb[7].mxu0 }
 0x383   : > { %v693_v43 = vpop.f32.mrb[0].mxu1 }
 0x384   : > { %v1459_v44 = vpop.f32.mrb[1].mxu1  ;;  %v699_v45 = vsel %vm540_vm2, %v693_v43, -inf }
 0x385   : > { %700 = vmax.xlane.f32.xlu0 %v699_v45  ;;  %v696_v46 = vpop.f32.mrb[2].mxu1 }
 0x386   : > { %v1460_v47 = vpop.f32.mrb[3].mxu1 }
 0x38b   : > { %v804_v48 = vpop.f32.mrb[4].mxu1 }
 0x38c   : > { %v1471_v49 = vpop.f32.mrb[5].mxu1  ;;  %v810_v50 = vsel %vm540_vm2, %v804_v48, -inf }
 0x38d   : > { %v807_v51 = vpop.f32.mrb[6].mxu1  ;;  %811 = vmax.xlane.f32.xlu1 %v810_v50  ;;  %v1584_v49 = vld [vmem:[%s2043_s5] sm:$0xff]   ;;  %v1585_v50 = vld [vmem:[%s2043_s5 + $0x8] sm:$0xff]  }
 0x38e   : > { %v1472_v52 = vpop.f32.mrb[7].mxu1  ;;  %1492 = vmatpush3.bf16.msra.mxu1 %v1584_v49 }
 0x38f   : > { %1493 = vmatprep.subr.bf16.mxu1 %v1682_v8 }
 0x392   : > { %1494 = vmatpush3.bf16.msra.mxu1 %v1585_v50 }
 0x393   : > { %v915_v53 = vpop.f32.mrb[8].mxu1  ;;  %1507 = vmatprep.subr.bf16.mxu1 %v1682_v8 }
 0x394   : > { %v1483_v54 = vpop.f32.mrb[9].mxu1  ;;  %v921_v55 = vsel %vm540_vm2, %v915_v53, -inf }
 0x395   : > { %922 = vmax.xlane.f32.xlu0 %v921_v55  ;;  %v918_v56 = vpop.f32.mrb[10].mxu1 }
 0x396   : > { %v1484_v57 = vpop.f32.mrb[11].mxu1 }
 0x40e   : > { %v589_v58 = vpop.xlane.xlu1 %588 }
 0x40f   : > { %v590_v59 = vsub.f32 %v581_v38, %v589_v58 }
 0x411   : > { %v591_v60 = vmul.f32 1.442695, %v590_v59 }
 0x412   : > { %v701_v61 = vpop.xlane.xlu0 %700 }
 0x413   : > { %1598 = vpow2.f32 %v591_v60  ;;  %v702_v62 = vsub.f32 %v693_v43, %v701_v61 }
 0x415   : > { %v703_v63 = vmul.f32 1.442695, %v702_v62 }
 0x417   : > { %1600 = vpow2.f32 %v703_v63 }
 0x41a   : > { %v812_v11 = vpop.xlane.xlu1 %811 }
 0x41b   : > { %v813_v12 = vsub.f32 %v804_v48, %v812_v11 }
 0x41d   : > { %v1599_v1 = vpop.eup %1598  ;;  %v814_v13 = vmul.f32 1.442695, %v813_v12 }
 0x41e   : > { %v593_v2 = vsel %vm540_vm2, %v1599_v1, 0.0 }
 0x41f   : > { %594 = vadd.xlane.f32.xlu1 %v593_v2 }
 0x421   : > { %v1601_v3 = vpop.eup %1600 }
 0x422   : > { %v923_v4 = vpop.xlane.xlu0 %922  ;;  %v705_v5 = vsel %vm540_vm2, %v1601_v3, 0.0 }
 0x423   : > { %v924_v6 = vsub.f32 %v915_v53, %v923_v4  ;;  %706 = vadd.xlane.f32.xlu0 %v705_v5  ;;  %v1378_v5 = vld [vmem:[%s2044_s6] ss:$0 sm:$0xff] }
 0x425   : > { %v925_v7 = vmul.f32 1.442695, %v924_v6 }
 0x427   : > { %1602 = vpow2.f32 %v925_v7 }
 0x428   : > { %1604 = vpow2.f32 %v814_v13 }
 0x430   : > { %599 = vrot.lane.b32.xlu1 %v1854_v25, %s1691_s15  ;;  %s1362_s15 = sshll.u32 %s429_s30, 3 }
 0x431   : > { %v1603_v9 = vpop.eup %1602 }
 0x432   : > { %v927_v10 = vsel %vm540_vm2, %v1603_v9, 0.0  ;;  %v1605_v14 = vpop.eup %1604 }
 0x433   : > { %928 = vadd.xlane.f32.xlu0 %v927_v10  ;;  %v816_v15 = vsel %vm540_vm2, %v1605_v14, 0.0 }
 0x449   : > { %711 = vrot.lane.b32.xlu0 %v1854_v25, %s1692_s16  ;;  %s1696_s16 = smov 16  }
 0x454   : > { %817 = vadd.xlane.f32.xlu1 %v816_v15 }
 0x465   : > { %822 = vrot.lane.b32.xlu1 %v1854_v25, %s1693_s20  ;;  %s1697_s20 = smov 24  }
 0x469   : > { %933 = vrot.lane.b32.xlu1 %v1854_v25, %s1694_s21  ;;  %s1398_s21 = sshll.u32 %s1790_s29, 7  ;;  %s1286_s29 = scalar_lea.sflag [#allocation3], %s429_s30 }
 0x46a   : > { %s1995_s1 = scalar_lea.hbm %s2051_s13, %s1398_s21 }
 0x4ac   : > { %v595_v16 = vpop.xlane.xlu1 %594 }
 0x4ad   : > { %1606 = vrcp.f32 %v595_v16 }
 0x4b0   : > { %v600_v17 = vpop.permute.xlu1 %599  ;;  %v707_v19 = vpop.xlane.xlu0 %706 }
 0x4b1   : > { %v606_v18 = vsel %vm604_vm3, %v600_v17, 0  ;;  %1608 = vrcp.f32 %v707_v19  ;;  %v1586_v19 = vld [vmem:[%s2047_s9] sm:$0xff]  }
 0x4b2   : > { %1450 = vmatpush3.bf16.msra.mxu0 %v606_v18 }
 0x4b3   : > { %1461 = vmatprep.subr.bf16.mxu0 %v1682_v8 }
 0x4b7   : > { %v1607_v20 = vpop.eup %1606 }
 0x4b8   : > { %v597_v21 = vmul.f32 %v1607_v20, %v1599_v1  ;;  %v1588_v20 = vld [vmem:[%s2049_s11] sm:$0xff]  }
 0x4ba   : > { %v598_v22 = vpack.c.bf16 %v597_v21, %v597_v21 }
 0x4bb   : > { %v1609_v23 = vpop.eup %1608 }
 0x4bc   : > { %1452 = vmatmul.mubr.msk.bf16.vlgmr.msra.gmra.mrb[8].mxu0 %vm540_vm2, %v598_v22  ;;  %v709_v25 = vmul.f32 %v1609_v23, %v1601_v3 }
 0x4bd   : > { %1463 = vmatprep.mubr.msk.bf16.mxu0 %vm1683_vm1, %v1682_v8 }
 0x4be   : > { %v710_v28 = vpack.c.bf16 %v709_v25, %v709_v25  ;;  %v1382_v25 = vld [vmem:[%s2045_s7] ss:$0 sm:$0xff] }
 0x4c0   : > { %v929_v24 = vpop.xlane.xlu0 %928 }
 0x4c4   : > { %v712_v26 = vpop.permute.xlu0 %711 }
 0x4c5   : > { %v717_v27 = vsel %vm604_vm3, %v712_v26, 0 }
 0x4c6   : > { %1462 = vmatpush3.bf16.msra.mxu0 %v717_v27  ;;  %v1383_v27 = vld [vmem:[%s2046_s8] ss:$0 sm:$0xff] }
 0x4c7   : > { %1473 = vmatprep.subr.bf16.mxu0 %v1682_v8 }
 0x4c9   : > { %1464 = vmatmul.mubr.msk.bf16.vlgmr.msra.gmra.mrb[12].mxu0 %vm540_vm2, %v710_v28 }
 0x4ca   : > { %1475 = vmatprep.mubr.msk.bf16.mxu0 %vm1683_vm1, %v1682_v8 }
 0x4e1   : > { %v818_v29 = vpop.xlane.xlu1 %817 }
 0x4e2   : > { %1610 = vrcp.f32 %v818_v29 }
 0x4e3   : > { %1612 = vrcp.f32 %v929_v24 }
 0x4e5   : > { %v823_v30 = vpop.permute.xlu1 %822 }
 0x4e6   : > { %v828_v31 = vsel %vm604_vm3, %v823_v30, 0 }
 0x4e7   : > { %1474 = vmatpush3.bf16.msra.mxu0 %v828_v31  ;;  %v1589_v31 = vld [vmem:[%s2049_s11 + $0x8] sm:$0xff]  }
 0x4e8   : > { %1485 = vmatprep.subr.bf16.mxu0 %v1682_v8 }
 0x4e9   : > { %v934_v34 = vpop.permute.xlu1 %933 }
 0x4ea   : > { %v939_v37 = vsel %vm604_vm3, %v934_v34, 0  ;;  %v1592_v34 = vld [vmem:[%s2049_s11 + $0x20] sm:$0xff]  }
 0x4ec   : > { %v1611_v32 = vpop.eup %1610 }
 0x4ed   : > { %v820_v33 = vmul.f32 %v1611_v32, %v1605_v14  ;;  %v1613_v36 = vpop.eup %1612  ;;  %v1590_v32 = vld [vmem:[%s2049_s11 + $0x10] sm:$0xff]  }
 0x4ee   : > { %v931_v38 = vmul.f32 %v1613_v36, %v1603_v9  ;;  %v1594_v36 = vld [vmem:[%s2049_s11 + $0x30] sm:$0xff]  }
 0x4ef   : > { %v821_v35 = vpack.c.bf16 %v820_v33, %v820_v33  ;;  %v1591_v33 = vld [vmem:[%s2049_s11 + $0x18] sm:$0xff]  }
 0x4f0   : > { %v932_v39 = vpack.c.bf16 %v931_v38, %v931_v38  ;;  %v1384_v38 = vld [vmem:[%s2048_s10] ss:$0 sm:$0xff] }
 0x4f1   : > { %1476 = vmatmul.mubr.msk.bf16.vlgmr.msra.gmra.mrb[16].mxu0 %vm540_vm2, %v821_v35  ;;  %v1593_v35 = vld [vmem:[%s2049_s11 + $0x28] sm:$0xff]  }
 0x4f2   : > { %1486 = vmatpush3.bf16.msra.mxu0 %v939_v37  ;;  %1487 = vmatprep.mubr.msk.bf16.mxu0 %vm1683_vm1, %v1682_v8  ;;  %v1595_v37 = vld [vmem:[%s2049_s11 + $0x38] sm:$0xff]  }
 0x4f3   : > { %1499 = vmatprep.subr.bf16.mxu0 %v1682_v8 }
 0x4f9   : > { %1488 = vmatmul.mubr.msk.bf16.vlgmr.msra.gmra.mrb[20].mxu0 %vm540_vm2, %v932_v39 }
 0x4fa   : > { %1503 = vmatprep.mubr.msk.bf16.mxu0 %vm1683_vm1, %v1682_v8  ;;  %1500 = vmatpush3.bf16.msra.mxu0 %v1586_v19 }
 0x4fb   : > { %1501 = vmatprep.subr.bf16.mxu0 %v1682_v8 }
 0x58f   : > { %v642_v40 = vpop.f32.mrb[8].mxu0 }
 0x590   : > { %v1453_v41 = vpop.f32.mrb[9].mxu0  ;;  %v648_v62 = vpack.c.bf16 %v642_v40, %v642_v40 }
 0x591   : > { %v645_v42 = vpop.f32.mrb[10].mxu0 }
 0x592   : > { %v1454_v43 = vpop.f32.mrb[11].mxu0 }
 0x59c   : > { %v753_v44 = vpop.f32.mrb[12].mxu0 }
 0x59d   : > { %v759_v45 = vpack.c.bf16 %v753_v44, %v753_v44  ;;  %v1465_v46 = vpop.f32.mrb[13].mxu0 }
 0x59e   : > { %v756_v47 = vpop.f32.mrb[14].mxu0 }
 0x59f   : > { %983 = vrot.lane.b32.xlu0 %v759_v45, %s1695_s22  ;;  %v1466_v48 = vpop.f32.mrb[15].mxu0  ;;  %s431_s22 = scalar_lea.vmem [#allocation2], %s1362_s15 }
 0x5a0   : > { %s1299_s23 = sshll.u32 %s431_s22, 4  ;;  %s1997_s23 = int_to_ptr.vmem [resolvable:$true] %s1299_s23 }
 0x5a1   : > { %s1618_s15 = scalar_lea.vmem %s1997_s23, 128 }
 0x5a2   : > { %p1619_p11 = scmp.ne.s32.totalorder %s1997_s23, %s1618_s15 }
 0x5a4   : > { %p1620_p12 = pnand %p1619_p11, %p1807_p5 }
 0x5a6   : > { %p1621_p13 = pneg %p1620_p12 }
 0x5c4   : > { %v864_v51 = vpop.f32.mrb[16].mxu0 }
 0x5c5   : > { %v870_v52 = vpack.c.bf16 %v864_v51, %v864_v51  ;;  %v1477_v53 = vpop.f32.mrb[17].mxu0 }
 0x5c6   : > { %v867_v54 = vpop.f32.mrb[18].mxu0  ;;  %v1388_v53 = vld [vmem:[%s2050_s12] ss:$0 sm:$0xff] }
 0x5c7   : > { %986 = vrot.lane.b32.xlu1 %v870_v52, %s1696_s16  ;;  %v1478_v55 = vpop.f32.mrb[19].mxu0  ;;  %s1698_s16 = smov [#allocation2]  }
 0x5cc   : > { %v975_v56 = vpop.f32.mrb[20].mxu0 }
 0x5cd   : > { %v981_v57 = vpack.c.bf16 %v975_v56, %v975_v56  ;;  %v1489_v58 = vpop.f32.mrb[21].mxu0 }
 0x5ce   : > { %v978_v59 = vpop.f32.mrb[22].mxu0 }
 0x5cf   : > { %989 = vrot.lane.b32.xlu0 %v981_v57, %s1697_s20  ;;  %v1490_v60 = vpop.f32.mrb[23].mxu0  ;;  %s1622_s20 = sshll.u32 %s1698_s16, 4  ;;  %s1623_s20 = int_to_ptr.vmem [resolvable:$false] %s1622_s20 }
 0x5d0   : > { %s1624_s2 = scalar_lea.vmem %s1623_s20, 256  ;;  %p1625_p0 = scmp.lt.s32.totalorder %s1997_s23, %s1623_s20 }
 0x5d1   : > { %p1626_p1 = scmp.lt.s32.totalorder %s1624_s2, %s1618_s15 }
 0x5d3   : > { %p1627_p2 = por %p1626_p1, %p1625_p0 }
 0x5d5   : > { %p1628_p3 = pnand %p1627_p2, %p1621_p13 }
 0x611   : > { %v984_v61 = vpop.permute.xlu0 %983 }
 0x612   : > { %v993_v1 = vsel %vm540_vm2, %v648_v62, %v984_v61 }
 0x639   : > { %v987_v63 = vpop.permute.xlu1 %986 }
 0x63a   : > { %v996_v2 = vsel %vm994_vm4, %v993_v1, %v987_v63 }
 0x641   : > { %v990_v3 = vpop.permute.xlu0 %989 }
 0x642   : > { %v999_v4 = vsel %vm997_vm5, %v996_v2, %v990_v3 }
 0x643   : > { %1496 = vmatmul.mubr.msk.bf16.vlgmr.msra.gmra.mrb[12].mxu1 %vm440_vm0, %v999_v4 }
 0x644   : > { %1523 = vmatprep.mubr.msk.bf16.mxu1 %vm1683_vm1, %v1682_v8  ;;  %1508 = vmatpush3.bf16.msra.mxu1 %v1588_v20 }
 0x645   : > { %1509 = vmatprep.subr.bf16.mxu1 %v1682_v8 }
 0x648   : > { %1510 = vmatpush3.bf16.msra.mxu1 %v1589_v31 }
 0x649   : > { %1511 = vmatprep.subr.bf16.mxu1 %v1682_v8 }
 0x64c   : > { %1512 = vmatpush3.bf16.msra.mxu1 %v1590_v32 }
 0x64d   : > { %1513 = vmatprep.subr.bf16.mxu1 %v1682_v8 }
 0x650   : > { %1514 = vmatpush3.bf16.msra.mxu1 %v1591_v33 }
 0x651   : > { %1515 = vmatprep.subr.bf16.mxu1 %v1682_v8 }
 0x654   : > { %1516 = vmatpush3.bf16.msra.mxu1 %v1592_v34 }
 0x655   : > { %1517 = vmatprep.subr.bf16.mxu1 %v1682_v8 }
 0x658   : > { %1518 = vmatpush3.bf16.msra.mxu1 %v1593_v35 }
 0x659   : > { %1519 = vmatprep.subr.bf16.mxu1 %v1682_v8 }
 0x65c   : > { %1520 = vmatpush3.bf16.msra.mxu1 %v1594_v36 }
 0x65d   : > { %1521 = vmatprep.subr.bf16.mxu1 %v1682_v8 }
 0x660   : > { %1522 = vmatpush3.bf16.msra.mxu1 %v1595_v37 }
 0x716   : > { %v1059_v6 = vpop.f32.mrb[12].mxu1 }
 0x717   : > { %v1060_v7 = vadd.f32 %v1378_v5, %v1059_v6  ;;  %v1497_v9 = vpop.f32.mrb[13].mxu1 }
 0x718   : > { %v1062_v10 = vpop.f32.mrb[14].mxu1 }
 0x719   : > { %v1932_v11 = vadd.f32 %v1060_v7, %v1822_v0  ;;  %v1498_v12 = vpop.f32.mrb[15].mxu1  ;;  %v1587_v0 = vld [vmem:[%s2047_s9 + $0x8] sm:$0xff]  }
 0x71a   : > { %1502 = vmatpush3.bf16.msra.mxu0 %v1587_v0 }
 0x71b   : > { %v1068_v13 = vsel %vm440_vm0, %v1932_v11, 0.0 }
 0x71c   : > { %1069 = vadd.xlane.f32.xlu1 %v1068_v13 }
 0x7a9   : > { %v1070_v14 = vpop.xlane.xlu1 %1069 }
 0x7aa   : > { %v1071_v15 = vmul.f32 0.03125, %v1070_v14 }
 0x7ac   : > { %v1072_v16 = vsub.f32 %v1932_v11, %v1071_v15 }
 0x7ae   : > { %v1073_v17 = vmul.f32 %v1072_v16, %v1072_v16 }
 0x7b0   : > { %v1074_v18 = vsel %vm440_vm0, %v1073_v17, 0.0 }
 0x7b1   : > { %1075 = vadd.xlane.f32.xlu0 %v1074_v18 }
 0x83e   : > { %v1076_v21 = vpop.xlane.xlu0 %1075 }
 0x83f   : > { %v1077_v22 = vmul.f32 0.03125, %v1076_v21 }
 0x841   : > { %v1078_v23 = vadd.f32 1e-06, %v1077_v22 }
 0x843   : > { %1614 = vrsqrt.f32 %v1078_v23 }
 0x84d   : > { %v1615_v24 = vpop.eup %1614 }
 0x84e   : > { %v1080_v26 = vmul.f32 %v1615_v24, %v1072_v16 }
 0x850   : > { %v1087_v28 = vmul.f32 %v1382_v25, %v1080_v26 }
 0x852   : > { %v1094_v29 = vadd.f32 %v1383_v27, %v1087_v28 }
 0x854   : > { %v1095_v30 = vpack.c.bf16 %v1094_v29, %v1094_v29 }
 0x856   : > { %1504 = vmatmul.mubr.msk.bf16.vlgmr.msra.gmra.mrb[24].mxu0 %vm440_vm0, %v1095_v30 }
 0x929   : > { %v1156_v39 = vpop.f32.mrb[24].mxu0 }
 0x92a   : > { %v1157_v40 = vadd.f32 %v1384_v38, %v1156_v39  ;;  %v1505_v41 = vpop.f32.mrb[25].mxu0 }
 0x92b   : > { %v1159_v42 = vpop.f32.mrb[26].mxu0 }
 0x92c   : > { %v1163_v43 = vmul.f32 0.044715, %v1157_v40  ;;  %v1506_v44 = vpop.f32.mrb[27].mxu0  ;;  %v1162_v8 = vmul.f32 0.5, %v1157_v40 }
 0x92e   : > { %v1164_v45 = vmul.f32 %v1163_v43, %v1157_v40 }
 0x930   : > { %v1165_v46 = vmul.f32 %v1164_v45, %v1157_v40 }
 0x932   : > { %v1166_v47 = vadd.f32 %v1165_v46, %v1157_v40 }
 0x934   : > { %v1167_v48 = vmul.f32 0.7978846, %v1166_v47 }
 0x936   : > { %1616 = vtanh.f32 %v1167_v48 }
 0x940   : > { %v1617_v49 = vpop.eup %1616 }
 0x941   : > { %v1169_v50 = vadd.f32 1.0, %v1617_v49 }
 0x943   : > { %v1170_v51 = vmul.f32 %v1169_v50, %v1162_v8 }
 0x945   : > { %v1171_v52 = vpack.c.bf16 %v1170_v51, %v1170_v51 }
 0x947   : > { %1524 = vmatmul.mubr.bf16.vlgmr.msra.gmra.mrb[16].mxu1 %v1171_v52 }
 0xa1a   : > { %v1277_v54 = vpop.f32.mrb[16].mxu1 }
 0xa1b   : > { %v1278_v55 = vadd.f32 %v1388_v53, %v1277_v54  ;;  %v1525_v56 = vpop.f32.mrb[17].mxu1 }
 0xa1c   : > { %v1280_v57 = vpop.f32.mrb[18].mxu1 }
 0xa1d   : > { %v1283_v58 = vadd.f32 %v1278_v55, %v1932_v11  ;;  %v1526_v59 = vpop.f32.mrb[19].mxu1 }
 0xa1f   : > { %1284 = vst.msk [vmem:[%s431_s22] sm:$0xff] %vm440_vm0, %v1283_v58 }
 0xa20   : > { %1631 = shalt.err (!%p1628_p3)
}
 0xa21   : > { %s1632_s0 = scalar_lea.hbm %s1995_s1, 128  ;;  %s1636_s22 = scalar_lea.hbm %s2051_s13, 256 }
 0xa22   : > { %p1633_p4 = scmp.ne.s32.totalorder %s1995_s1, %s1632_s0  ;;  %p1637_p9 = scmp.lt.u32.totalorder %s1995_s1, %s2051_s13 }
 0xa23   : > { %p1638_p10 = scmp.lt.u32.totalorder %s1636_s22, %s1632_s0  ;;  %p1640_p12 = scmp.lt.u32.totalorder %s1632_s0, %s1995_s1 }
 0xa24   : > { %p1634_p7 = pnand %p1633_p4, %p1807_p5 }
 0xa25   : > { %p1639_p11 = por %p1638_p10, %p1637_p9 }
 0xa26   : > { %p1635_p8 = pneg %p1634_p7 }
 0xa27   : > { %p1641_p13 = por %p1640_p12, %p1639_p11 }
 0xa29   : > { %p1642_p0 = pnand %p1641_p13, %p1635_p8 }
 0xa2b   : > { %1645 = shalt.err (!%p1642_p0)
}
 0xa2c   : > { %1527 = dma.vmem_to_hbm [thread:$0]  (%p1807_p5), %s1997_s23, 128, %s1995_s1, %s1286_s29  }
 0xa2d PF: > { %p1533_p1 = scmp.ge.s32.totalorder %s1680_s28, 2  ;;  %s1311_s2 = sand.u32 1, %s1668_s25  }
 0xa2e   : > { %s1312_s15 = scalar_lea.sflag [#allocation3], %s1311_s2 }
 0xa2f   : > { %p1530_p2 = pnand %p1533_p1, %p1811_p6 }
 0xa31   : > { %1663 = dma.done.wait (!%p1530_p2), %s1312_s15, 128  }
 0xa32   : > { %1665 = vsyncadd (!%p1530_p2), %s1312_s15, 4294967168  ;;  %p23_p3 = scmp.ge.s32.totalorder %s1794_s14, 4   ;;  %s2060_s25 = smov %s1672_s26 }
 0xa33   : > { %s2061_s26 = smov %s1676_s27  ;;  %s2062_s27 = smov %s1805_s17 }
 0xa34   : > { %s2063_s28 = smov %s1794_s14  ;;  %25 = sbr.rel (!%p23_p3) target bundleno = 7 (0x7), region = 107 }
 0xa3b   :  { %1317 = vsyncpa [#allocation3], 1 }
 0xa3c   :  { %1319 = vsyncpa [#allocation3 + $0x1], 1 }

// kernel: tpu_custom_call.1
= control target key start
LH: loop header
LB: loop body
LE: loop exit
PB: predicated region body
PF: predicated region fallthrough
CT: control target
= control target key end

     0   :  { %s2038_s0 = inlined_call_operand.vmem [shape: f32[2,8,32], index: 0, kind: input, shape index: {}]   ;;  %s2039_s1 = inlined_call_operand.vmem [shape: f32[1,32], index: 1, kind: input, shape index: {}]   ;;  %s2040_s2 = inlined_call_operand.vmem [shape: f32[1,32], index: 2, kind: input, shape index: {}]   ;;  %s2041_s3 = inlined_call_operand.vmem [shape: bf16[32,96], index: 3, kind: input, shape index: {}]   ;;  %s2042_s4 = inlined_call_operand.vmem [shape: f32[1,96], index: 4, kind: input, shape index: {}]   ;;  %s2043_s5 = inlined_call_operand.vmem [shape: bf16[32,32], index: 5, kind: input, shape index: {}]   ;;  %s2044_s6 = inlined_call_operand.vmem [shape: f32[1,32], index: 6, kind: input, shape index: {}]   ;;  %s2045_s7 = inlined_call_operand.vmem [shape: f32[1,32], index: 7, kind: input, shape index: {}]   ;;  %s2046_s8 = inlined_call_operand.vmem [shape: f32[1,32], index: 8, kind: input, shape index: {}]   ;;  %s2047_s9 = inlined_call_operand.vmem [shape: bf16[32,128], index: 9, kind: input, shape index: {}]   ;;  %s2048_s10 = inlined_call_operand.vmem [shape: f32[1,128], index: 10, kind: input, shape index: {}]   ;;  %s2049_s11 = inlined_call_operand.vmem [shape: bf16[128,32], index: 11, kind: input, shape index: {}]   ;;  %s2050_s12 = inlined_call_operand.vmem [shape: f32[1,32], index: 12, kind: input, shape index: {}]   ;;  %s2051_s13 = inlined_call_operand.hbm [shape: f32[2,8,32], index: 13, kind: output, shape index: {}]  }
   0x1   :  { %2052 = sst [smem:[#allocation5_spill]] %s2038_s0 }
   0x2   :  { %2053 = sst [smem:[#allocation6_spill]] %s2039_s1 }
   0x3   :  { %2054 = sst [smem:[#allocation7_spill]] %s2040_s2 }
   0x4   :  { %18 = vsyncpa [#allocation3], 0 }
   0x5   :  { %20 = vsyncpa [#allocation3 + $0x1], 0  ;;  %s1769_s25 = smov 0   ;;  %s1771_s26 = smov 0  }
   0x6   :  { %s1773_s27 = smov 0   ;;  %s1775_s28 = smov 0  }
   0x7 LB: > { %s1790_s29 = sadd.s32 4294967295, %s1680_s28   ;;  %s1358_s30 = sadd.s32 4294967294, %s1680_s28   ;;  %s1680_s28 = sphi %s1775_s28, %s2063_s28   ;;  %s1676_s27 = sphi %s1773_s27, %s2062_s27   ;;  %s1672_s26 = sphi %s1771_s26, %s2061_s26   ;;  %s1668_s25 = sphi %s1769_s25, %s2060_s25  }
   0x8   : > { %s1794_s14 = sadd.s32 1, %s1680_s28   ;;  %s311_s15 = sadd.s32 1, %s1676_s27 }
   0x9   : > { %s308_s16 = ssub.s32 %s1680_s28, %s1794_s14  ;;  %p321_p0 = scmp.ne.s32.totalorder %s1676_s27, %s1672_s26 }
   0xa   : > { %p309_p1 = scmp.eq.s32.totalorder %s308_s16, 0  ;;  %p322_p2 = scmp.eq.s32.totalorder %s1790_s29, 1 }
   0xb   : > { %p327_p3 = scmp.ne.s32.totalorder %s1672_s26, %s1668_s25  ;;  %p328_p4 = scmp.eq.s32.totalorder %s1358_s30, 1 }
   0xc   : > { %s1805_s17 = scalar_select %p309_p1, %s1676_s27, %s311_s15  }
   0xd   : > { %p1807_p5 = por %p322_p2, %p321_p0  ;;  %p1811_p6 = por %p328_p4, %p327_p3 }
   0xe   : > { %p1361_p7 = scmp.ge.s32.totalorder %s1680_s28, 1  ;;  %p389_p8 = scmp.lt.s32.totalorder %s1680_s28, 3 }
  0x10   : > { %p390_p9 = pnand %p1361_p7, %p389_p8 }
  0x11   : > { %p432_p10 = scmp.lt.s32.totalorder (!%p390_p9), %s1790_s29, 1  ;;  %vm440_vm0 = vcmask (!%p390_p9), 261120   ;;  %s2057_s0 = sld [smem:[#allocation5_spill]] (!%p390_p9)  ;;  %v1582_v7 = vld [vmem:[%s2041_s3] sm:$0xff] (!%p390_p9)   ;;  %v1682_v8 = vmov (!%p390_p9), 0.0   ;;  %vm1683_vm1 = vmmov (!%p390_p9), 0  }
  0x12   : > { %393 = sbr.rel (%p390_p9) target bundleno = 2605 (0xa2d), region = 72  ;;  %1435 = vmatprep.subr.bf16.mxu0 (!%p390_p9), %v1682_v8  ;;  %1439 = vmatprep.mubr.msk.bf16.mxu0 (!%p390_p9), %vm1683_vm1, %v1682_v8  ;;  %v1583_v9 = vld [vmem:[%s2041_s3 + $0x8] sm:$0xff] (!%p390_p9)   ;;  %s2058_s1 = sld [smem:[#allocation6_spill]] (!%p390_p9)  ;;  %v1366_v20 = vld [vmem:[%s2042_s4] ss:$0 sm:$0xff] (!%p390_p9)  ;;  %vm540_vm2 = vcmask (!%p390_p9), 64512  }
  0x13   : > { %1436 = vmatpush3.bf16.msra.mxu0 (!%p390_p9), %v1582_v7  ;;  %1455 = vmatprep.subr.bf16.mxu1 (!%p390_p9), %v1682_v8  ;;  %s2059_s2 = sld [smem:[#allocation7_spill]] (!%p390_p9)  ;;  %s1684_s16 = smov (!%p390_p9), 120   ;;  %vm604_vm3 = vcmask (!%p390_p9), 1043456   ;;  %vm994_vm4 = vcmask (!%p390_p9), 130048   ;;  %vm997_vm5 = vcmask (!%p390_p9), 195584  }
  0x14   : > { %1437 = vmatprep.subr.bf16.mxu0 (!%p390_p9), %v1682_v8  ;;  %1457 = vmatprep.mubr.msk.bf16.mxu1 (!%p390_p9), %vm1683_vm1, %v1682_v8  ;;  %s1687_s22 = smov (!%p390_p9), 80   ;;  %s1688_s23 = smov (!%p390_p9), 112  }
  0x15   : > { %s1690_s30 = smov (!%p390_p9), 104   ;;  %s1691_s15 = smov (!%p390_p9), 64  }
  0x17   : > { %1438 = vmatpush3.bf16.msra.mxu0 (!%p390_p9), %v1583_v9 }
  0x18   : > { %1443 = vmatprep.subr.bf16.mxu0 (!%p390_p9), %v1682_v8  ;;  %v1364_v14 = vld [vmem:[%s2058_s1] ss:$0 sm:$0xff] (!%p390_p9) }
  0x19   : > { %s433_s20 = scalar_select %p432_p10, %s1790_s29, 1  ;;  %v1365_v16 = vld [vmem:[%s2059_s2] ss:$0 sm:$0xff] }
  0x1b   : > { %s1363_s21 = sshll.u32 %s433_s20, 3  ;;  %s1685_s20 = smov 96  }
  0x1c   : > { %s435_s24 = scalar_lea.vmem %s2057_s0, %s1363_s21  ;;  %s1686_s21 = smov 88  }
  0x1d   : > { %v1822_v0 = vld [vmem:[%s435_s24] sm:$0xff]  ;;  %s1689_s24 = smov 72  }
  0x1e   : > { %v441_v1 = vsel %vm440_vm0, %v1822_v0, 0.0 }
  0x1f   : > { %442 = vadd.xlane.f32.xlu0 %v441_v1 }
  0xac   : > { %v443_v2 = vpop.xlane.xlu0 %442 }
  0xad   : > { %v445_v3 = vmul.f32 0.03125, %v443_v2 }
  0xaf   : > { %v446_v4 = vsub.f32 %v1822_v0, %v445_v3 }
  0xb1   : > { %v447_v5 = vmul.f32 %v446_v4, %v446_v4 }
  0xb3   : > { %v448_v6 = vsel %vm440_vm0, %v447_v5, 0.0 }
  0xb4   : > { %449 = vadd.xlane.f32.xlu0 %v448_v6 }
 0x141   : > { %v450_v10 = vpop.xlane.xlu0 %449 }
 0x142   : > { %v451_v11 = vmul.f32 0.03125, %v450_v10 }
 0x144   : > { %v452_v12 = vadd.f32 1e-06, %v451_v11 }
 0x146   : > { %1596 = vrsqrt.f32 %v452_v12 }
 0x150   : > { %v1597_v13 = vpop.eup %1596 }
 0x151   : > { %v454_v15 = vmul.f32 %v1597_v13, %v446_v4 }
 0x153   : > { %v461_v17 = vmul.f32 %v1364_v14, %v454_v15 }
 0x155   : > { %v468_v18 = vadd.f32 %v1365_v16, %v461_v17 }
 0x157   : > { %v469_v19 = vpack.c.bf16 %v468_v18, %v468_v18 }
 0x159   : > { %1440 = vmatmul.mubr.msk.bf16.vlgmr.msra.gmra.mrb[0].mxu0 %vm440_vm0, %v469_v19 }
 0x15a   : > { %1445 = vmatprep.mubr.msk.bf16.mxu0 %vm1683_vm1, %v1682_v8 }
 0x22c   : > { %v530_v21 = vpop.f32.mrb[0].mxu0 }
 0x22d   : > { %v531_v22 = vadd.f32 %v1366_v20, %v530_v21  ;;  %v1441_v23 = vpop.f32.mrb[1].mxu0 }
 0x22e   : > { %v533_v24 = vpop.f32.mrb[2].mxu0 }
 0x22f   : > { %v1854_v25 = vpack.c.bf16 %v531_v22, %v531_v22  ;;  %v1442_v26 = vpop.f32.mrb[3].mxu0 }
 0x231   : > { %649 = vrot.lane.b32.xlu0 %v1854_v25, %s1684_s16  ;;  %538 = vrot.lane.b32.xlu1 %v1854_v25, %s1685_s20  ;;  %s1692_s16 = smov 56   ;;  %s1693_s20 = smov 48  }
 0x235   : > { %651 = vrot.lane.b32.xlu1 %v1854_v25, %s1686_s21  ;;  %s1694_s21 = smov 40  }
 0x239   : > { %762 = vrot.lane.b32.xlu1 %v1854_v25, %s1687_s22  ;;  %s1695_s22 = smov 8  }
 0x23d   : > { %760 = vrot.lane.b32.xlu1 %v1854_v25, %s1688_s23 }
 0x241   : > { %873 = vrot.lane.b32.xlu1 %v1854_v25, %s1689_s24 }
 0x245   : > { %871 = vrot.lane.b32.xlu1 %v1854_v25, %s1690_s30  ;;  %s429_s30 = sand.u32 1, %s1672_s26  }
 0x2a3   : > { %v539_v27 = vpop.permute.xlu1 %538  ;;  %v650_v32 = vpop.permute.xlu0 %649 }
 0x2a4   : > { %v545_v28 = vsel %vm540_vm2, %v539_v27, 0 }
 0x2a5   : > { %1444 = vmatpush3.bf16.xpose.msra.mxu0 %v545_v28 }
 0x2a6   : > { %1449 = vmatprep.subr.bf16.mxu0 %v1682_v8 }
 0x2a7   : > { %v652_v29 = vpop.permute.xlu1 %651 }
 0x2a8   : > { %v657_v30 = vsel %vm540_vm2, %v652_v29, 0 }
 0x2a9   : > { %1456 = vmatpush3.bf16.xpose.msra.mxu1 %v657_v30 }
 0x2aa   : > { %1467 = vmatprep.subr.bf16.mxu1 %v1682_v8 }
 0x2ab   : > { %v763_v31 = vpop.permute.xlu1 %762 }
 0x2ac   : > { %1446 = vmatmul.mubr.msk.bf16.vlgmr.msra.gmra.mrb[4].mxu0 %vm540_vm2, %v1854_v25  ;;  %v768_v34 = vsel %vm540_vm2, %v763_v31, 0 }
 0x2ad   : > { %1451 = vmatprep.mubr.msk.bf16.mxu0 %vm1683_vm1, %v1682_v8 }
 0x2af   : > { %v761_v33 = vpop.permute.xlu1 %760 }
 0x2b0   : > { %1458 = vmatmul.mubr.msk.bf16.vlgmr.msra.gmra.mrb[0].mxu1 %vm540_vm2, %v650_v32 }
 0x2b1   : > { %1468 = vmatpush3.bf16.xpose.msra.mxu1 %v768_v34  ;;  %1469 = vmatprep.mubr.msk.bf16.mxu1 %vm1683_vm1, %v1682_v8 }
 0x2b2   : > { %1479 = vmatprep.subr.bf16.mxu1 %v1682_v8 }
 0x2b3   : > { %v874_v35 = vpop.permute.xlu1 %873 }
 0x2b4   : > { %v879_v36 = vsel %vm540_vm2, %v874_v35, 0 }
 0x2b7   : > { %v872_v37 = vpop.permute.xlu1 %871 }
 0x2b8   : > { %1470 = vmatmul.mubr.msk.bf16.vlgmr.msra.gmra.mrb[4].mxu1 %vm540_vm2, %v761_v33 }
 0x2b9   : > { %1480 = vmatpush3.bf16.xpose.msra.mxu1 %v879_v36  ;;  %1481 = vmatprep.mubr.msk.bf16.mxu1 %vm1683_vm1, %v1682_v8 }
 0x2ba   : > { %1491 = vmatprep.subr.bf16.mxu1 %v1682_v8 }
 0x2c0   : > { %1482 = vmatmul.mubr.msk.bf16.vlgmr.msra.gmra.mrb[8].mxu1 %vm540_vm2, %v872_v37 }
 0x2c1   : > { %1495 = vmatprep.mubr.msk.bf16.mxu1 %vm1683_vm1, %v1682_v8 }
 0x37f   : > { %v581_v38 = vpop.f32.mrb[4].mxu0 }
 0x380   : > { %v1447_v39 = vpop.f32.mrb[5].mxu0  ;;  %v587_v40 = vsel %vm540_vm2, %v581_v38, -inf }
 0x381   : > { %588 = vmax.xlane.f32.xlu1 %v587_v40  ;;  %v584_v41 = vpop.f32.mrb[6].mxu0 }
 0x382   : > { %v1448_v42 = vpop.f32.mrb[7].mxu0 }
 0x383   : > { %v693_v43 = vpop.f32.mrb[0].mxu1 }
 0x384   : > { %v1459_v44 = vpop.f32.mrb[1].mxu1  ;;  %v699_v45 = vsel %vm540_vm2, %v693_v43, -inf }
 0x385   : > { %700 = vmax.xlane.f32.xlu0 %v699_v45  ;;  %v696_v46 = vpop.f32.mrb[2].mxu1 }
 0x386   : > { %v1460_v47 = vpop.f32.mrb[3].mxu1 }
 0x38b   : > { %v804_v48 = vpop.f32.mrb[4].mxu1 }
 0x38c   : > { %v1471_v49 = vpop.f32.mrb[5].mxu1  ;;  %v810_v50 = vsel %vm540_vm2, %v804_v48, -inf }
 0x38d   : > { %v807_v51 = vpop.f32.mrb[6].mxu1  ;;  %811 = vmax.xlane.f32.xlu1 %v810_v50  ;;  %v1584_v49 = vld [vmem:[%s2043_s5] sm:$0xff]   ;;  %v1585_v50 = vld [vmem:[%s2043_s5 + $0x8] sm:$0xff]  }
 0x38e   : > { %v1472_v52 = vpop.f32.mrb[7].mxu1  ;;  %1492 = vmatpush3.bf16.msra.mxu1 %v1584_v49 }
 0x38f   : > { %1493 = vmatprep.subr.bf16.mxu1 %v1682_v8 }
 0x392   : > { %1494 = vmatpush3.bf16.msra.mxu1 %v1585_v50 }
 0x393   : > { %v915_v53 = vpop.f32.mrb[8].mxu1  ;;  %1507 = vmatprep.subr.bf16.mxu1 %v1682_v8 }
 0x394   : > { %v1483_v54 = vpop.f32.mrb[9].mxu1  ;;  %v921_v55 = vsel %vm540_vm2, %v915_v53, -inf }
 0x395   : > { %922 = vmax.xlane.f32.xlu0 %v921_v55  ;;  %v918_v56 = vpop.f32.mrb[10].mxu1 }
 0x396   : > { %v1484_v57 = vpop.f32.mrb[11].mxu1 }
 0x40e   : > { %v589_v58 = vpop.xlane.xlu1 %588 }
 0x40f   : > { %v590_v59 = vsub.f32 %v581_v38, %v589_v58 }
 0x411   : > { %v591_v60 = vmul.f32 1.442695, %v590_v59 }
 0x412   : > { %v701_v61 = vpop.xlane.xlu0 %700 }
 0x413   : > { %1598 = vpow2.f32 %v591_v60  ;;  %v702_v62 = vsub.f32 %v693_v43, %v701_v61 }
 0x415   : > { %v703_v63 = vmul.f32 1.442695, %v702_v62 }
 0x417   : > { %1600 = vpow2.f32 %v703_v63 }
 0x41a   : > { %v812_v11 = vpop.xlane.xlu1 %811 }
 0x41b   : > { %v813_v12 = vsub.f32 %v804_v48, %v812_v11 }
 0x41d   : > { %v1599_v1 = vpop.eup %1598  ;;  %v814_v13 = vmul.f32 1.442695, %v813_v12 }
 0x41e   : > { %v593_v2 = vsel %vm540_vm2, %v1599_v1, 0.0 }
 0x41f   : > { %594 = vadd.xlane.f32.xlu1 %v593_v2 }
 0x421   : > { %v1601_v3 = vpop.eup %1600 }
 0x422   : > { %v923_v4 = vpop.xlane.xlu0 %922  ;;  %v705_v5 = vsel %vm540_vm2, %v1601_v3, 0.0 }
 0x423   : > { %v924_v6 = vsub.f32 %v915_v53, %v923_v4  ;;  %706 = vadd.xlane.f32.xlu0 %v705_v5  ;;  %v1378_v5 = vld [vmem:[%s2044_s6] ss:$0 sm:$0xff] }
 0x425   : > { %v925_v7 = vmul.f32 1.442695, %v924_v6 }
 0x427   : > { %1602 = vpow2.f32 %v925_v7 }
 0x428   : > { %1604 = vpow2.f32 %v814_v13 }
 0x430   : > { %599 = vrot.lane.b32.xlu1 %v1854_v25, %s1691_s15  ;;  %s1362_s15 = sshll.u32 %s429_s30, 3 }
 0x431   : > { %v1603_v9 = vpop.eup %1602 }
 0x432   : > { %v927_v10 = vsel %vm540_vm2, %v1603_v9, 0.0  ;;  %v1605_v14 = vpop.eup %1604 }
 0x433   : > { %928 = vadd.xlane.f32.xlu0 %v927_v10  ;;  %v816_v15 = vsel %vm540_vm2, %v1605_v14, 0.0 }
 0x449   : > { %711 = vrot.lane.b32.xlu0 %v1854_v25, %s1692_s16  ;;  %s1696_s16 = smov 16  }
 0x454   : > { %817 = vadd.xlane.f32.xlu1 %v816_v15 }
 0x465   : > { %822 = vrot.lane.b32.xlu1 %v1854_v25, %s1693_s20  ;;  %s1697_s20 = smov 24  }
 0x469   : > { %933 = vrot.lane.b32.xlu1 %v1854_v25, %s1694_s21  ;;  %s1398_s21 = sshll.u32 %s1790_s29, 7  ;;  %s1286_s29 = scalar_lea.sflag [#allocation3], %s429_s30 }
 0x46a   : > { %s1995_s1 = scalar_lea.hbm %s2051_s13, %s1398_s21 }
 0x4ac   : > { %v595_v16 = vpop.xlane.xlu1 %594 }
 0x4ad   : > { %1606 = vrcp.f32 %v595_v16 }
 0x4b0   : > { %v600_v17 = vpop.permute.xlu1 %599  ;;  %v707_v19 = vpop.xlane.xlu0 %706 }
 0x4b1   : > { %v606_v18 = vsel %vm604_vm3, %v600_v17, 0  ;;  %1608 = vrcp.f32 %v707_v19  ;;  %v1586_v19 = vld [vmem:[%s2047_s9] sm:$0xff]  }
 0x4b2   : > { %1450 = vmatpush3.bf16.msra.mxu0 %v606_v18 }
 0x4b3   : > { %1461 = vmatprep.subr.bf16.mxu0 %v1682_v8 }
 0x4b7   : > { %v1607_v20 = vpop.eup %1606 }
 0x4b8   : > { %v597_v21 = vmul.f32 %v1607_v20, %v1599_v1  ;;  %v1588_v20 = vld [vmem:[%s2049_s11] sm:$0xff]  }
 0x4ba   : > { %v598_v22 = vpack.c.bf16 %v597_v21, %v597_v21 }
 0x4bb   : > { %v1609_v23 = vpop.eup %1608 }
 0x4bc   : > { %1452 = vmatmul.mubr.msk.bf16.vlgmr.msra.gmra.mrb[8].mxu0 %vm540_vm2, %v598_v22  ;;  %v709_v25 = vmul.f32 %v1609_v23, %v1601_v3 }
 0x4bd   : > { %1463 = vmatprep.mubr.msk.bf16.mxu0 %vm1683_vm1, %v1682_v8 }
 0x4be   : > { %v710_v28 = vpack.c.bf16 %v709_v25, %v709_v25  ;;  %v1382_v25 = vld [vmem:[%s2045_s7] ss:$0 sm:$0xff] }
 0x4c0   : > { %v929_v24 = vpop.xlane.xlu0 %928 }
 0x4c4   : > { %v712_v26 = vpop.permute.xlu0 %711 }
 0x4c5   : > { %v717_v27 = vsel %vm604_vm3, %v712_v26, 0 }
 0x4c6   : > { %1462 = vmatpush3.bf16.msra.mxu0 %v717_v27  ;;  %v1383_v27 = vld [vmem:[%s2046_s8] ss:$0 sm:$0xff] }
 0x4c7   : > { %1473 = vmatprep.subr.bf16.mxu0 %v1682_v8 }
 0x4c9   : > { %1464 = vmatmul.mubr.msk.bf16.vlgmr.msra.gmra.mrb[12].mxu0 %vm540_vm2, %v710_v28 }
 0x4ca   : > { %1475 = vmatprep.mubr.msk.bf16.mxu0 %vm1683_vm1, %v1682_v8 }
 0x4e1   : > { %v818_v29 = vpop.xlane.xlu1 %817 }
 0x4e2   : > { %1610 = vrcp.f32 %v818_v29 }
 0x4e3   : > { %1612 = vrcp.f32 %v929_v24 }
 0x4e5   : > { %v823_v30 = vpop.permute.xlu1 %822 }
 0x4e6   : > { %v828_v31 = vsel %vm604_vm3, %v823_v30, 0 }
 0x4e7   : > { %1474 = vmatpush3.bf16.msra.mxu0 %v828_v31  ;;  %v1589_v31 = vld [vmem:[%s2049_s11 + $0x8] sm:$0xff]  }
 0x4e8   : > { %1485 = vmatprep.subr.bf16.mxu0 %v1682_v8 }
 0x4e9   : > { %v934_v34 = vpop.permute.xlu1 %933 }
 0x4ea   : > { %v939_v37 = vsel %vm604_vm3, %v934_v34, 0  ;;  %v1592_v34 = vld [vmem:[%s2049_s11 + $0x20] sm:$0xff]  }
 0x4ec   : > { %v1611_v32 = vpop.eup %1610 }
 0x4ed   : > { %v820_v33 = vmul.f32 %v1611_v32, %v1605_v14  ;;  %v1613_v36 = vpop.eup %1612  ;;  %v1590_v32 = vld [vmem:[%s2049_s11 + $0x10] sm:$0xff]  }
 0x4ee   : > { %v931_v38 = vmul.f32 %v1613_v36, %v1603_v9  ;;  %v1594_v36 = vld [vmem:[%s2049_s11 + $0x30] sm:$0xff]  }
 0x4ef   : > { %v821_v35 = vpack.c.bf16 %v820_v33, %v820_v33  ;;  %v1591_v33 = vld [vmem:[%s2049_s11 + $0x18] sm:$0xff]  }
 0x4f0   : > { %v932_v39 = vpack.c.bf16 %v931_v38, %v931_v38  ;;  %v1384_v38 = vld [vmem:[%s2048_s10] ss:$0 sm:$0xff] }
 0x4f1   : > { %1476 = vmatmul.mubr.msk.bf16.vlgmr.msra.gmra.mrb[16].mxu0 %vm540_vm2, %v821_v35  ;;  %v1593_v35 = vld [vmem:[%s2049_s11 + $0x28] sm:$0xff]  }
 0x4f2   : > { %1486 = vmatpush3.bf16.msra.mxu0 %v939_v37  ;;  %1487 = vmatprep.mubr.msk.bf16.mxu0 %vm1683_vm1, %v1682_v8  ;;  %v1595_v37 = vld [vmem:[%s2049_s11 + $0x38] sm:$0xff]  }
 0x4f3   : > { %1499 = vmatprep.subr.bf16.mxu0 %v1682_v8 }
 0x4f9   : > { %1488 = vmatmul.mubr.msk.bf16.vlgmr.msra.gmra.mrb[20].mxu0 %vm540_vm2, %v932_v39 }
 0x4fa   : > { %1503 = vmatprep.mubr.msk.bf16.mxu0 %vm1683_vm1, %v1682_v8  ;;  %1500 = vmatpush3.bf16.msra.mxu0 %v1586_v19 }
 0x4fb   : > { %1501 = vmatprep.subr.bf16.mxu0 %v1682_v8 }
 0x58f   : > { %v642_v40 = vpop.f32.mrb[8].mxu0 }
 0x590   : > { %v1453_v41 = vpop.f32.mrb[9].mxu0  ;;  %v648_v62 = vpack.c.bf16 %v642_v40, %v642_v40 }
 0x591   : > { %v645_v42 = vpop.f32.mrb[10].mxu0 }
 0x592   : > { %v1454_v43 = vpop.f32.mrb[11].mxu0 }
 0x59c   : > { %v753_v44 = vpop.f32.mrb[12].mxu0 }
 0x59d   : > { %v759_v45 = vpack.c.bf16 %v753_v44, %v753_v44  ;;  %v1465_v46 = vpop.f32.mrb[13].mxu0 }
 0x59e   : > { %v756_v47 = vpop.f32.mrb[14].mxu0 }
 0x59f   : > { %983 = vrot.lane.b32.xlu0 %v759_v45, %s1695_s22  ;;  %v1466_v48 = vpop.f32.mrb[15].mxu0  ;;  %s431_s22 = scalar_lea.vmem [#allocation2], %s1362_s15 }
 0x5a0   : > { %s1299_s23 = sshll.u32 %s431_s22, 4  ;;  %s1997_s23 = int_to_ptr.vmem [resolvable:$true] %s1299_s23 }
 0x5a1   : > { %s1618_s15 = scalar_lea.vmem %s1997_s23, 128 }
 0x5a2   : > { %p1619_p11 = scmp.ne.s32.totalorder %s1997_s23, %s1618_s15 }
 0x5a4   : > { %p1620_p12 = pnand %p1619_p11, %p1807_p5 }
 0x5a6   : > { %p1621_p13 = pneg %p1620_p12 }
 0x5c4   : > { %v864_v51 = vpop.f32.mrb[16].mxu0 }
 0x5c5   : > { %v870_v52 = vpack.c.bf16 %v864_v51, %v864_v51  ;;  %v1477_v53 = vpop.f32.mrb[17].mxu0 }
 0x5c6   : > { %v867_v54 = vpop.f32.mrb[18].mxu0  ;;  %v1388_v53 = vld [vmem:[%s2050_s12] ss:$0 sm:$0xff] }
 0x5c7   : > { %986 = vrot.lane.b32.xlu1 %v870_v52, %s1696_s16  ;;  %v1478_v55 = vpop.f32.mrb[19].mxu0  ;;  %s1698_s16 = smov [#allocation2]  }
 0x5cc   : > { %v975_v56 = vpop.f32.mrb[20].mxu0 }
 0x5cd   : > { %v981_v57 = vpack.c.bf16 %v975_v56, %v975_v56  ;;  %v1489_v58 = vpop.f32.mrb[21].mxu0 }
 0x5ce   : > { %v978_v59 = vpop.f32.mrb[22].mxu0 }
 0x5cf   : > { %989 = vrot.lane.b32.xlu0 %v981_v57, %s1697_s20  ;;  %v1490_v60 = vpop.f32.mrb[23].mxu0  ;;  %s1622_s20 = sshll.u32 %s1698_s16, 4  ;;  %s1623_s20 = int_to_ptr.vmem [resolvable:$false] %s1622_s20 }
 0x5d0   : > { %s1624_s2 = scalar_lea.vmem %s1623_s20, 256  ;;  %p1625_p0 = scmp.lt.s32.totalorder %s1997_s23, %s1623_s20 }
 0x5d1   : > { %p1626_p1 = scmp.lt.s32.totalorder %s1624_s2, %s1618_s15 }
 0x5d3   : > { %p1627_p2 = por %p1626_p1, %p1625_p0 }
 0x5d5   : > { %p1628_p3 = pnand %p1627_p2, %p1621_p13 }
 0x611   : > { %v984_v61 = vpop.permute.xlu0 %983 }
 0x612   : > { %v993_v1 = vsel %vm540_vm2, %v648_v62, %v984_v61 }
 0x639   : > { %v987_v63 = vpop.permute.xlu1 %986 }
 0x63a   : > { %v996_v2 = vsel %vm994_vm4, %v993_v1, %v987_v63 }
 0x641   : > { %v990_v3 = vpop.permute.xlu0 %989 }
 0x642   : > { %v999_v4 = vsel %vm997_vm5, %v996_v2, %v990_v3 }
 0x643   : > { %1496 = vmatmul.mubr.msk.bf16.vlgmr.msra.gmra.mrb[12].mxu1 %vm440_vm0, %v999_v4 }
 0x644   : > { %1523 = vmatprep.mubr.msk.bf16.mxu1 %vm1683_vm1, %v1682_v8  ;;  %1508 = vmatpush3.bf16.msra.mxu1 %v1588_v20 }
 0x645   : > { %1509 = vmatprep.subr.bf16.mxu1 %v1682_v8 }
 0x648   : > { %1510 = vmatpush3.bf16.msra.mxu1 %v1589_v31 }
 0x649   : > { %1511 = vmatprep.subr.bf16.mxu1 %v1682_v8 }
 0x64c   : > { %1512 = vmatpush3.bf16.msra.mxu1 %v1590_v32 }
 0x64d   : > { %1513 = vmatprep.subr.bf16.mxu1 %v1682_v8 }
 0x650   : > { %1514 = vmatpush3.bf16.msra.mxu1 %v1591_v33 }
 0x651   : > { %1515 = vmatprep.subr.bf16.mxu1 %v1682_v8 }
 0x654   : > { %1516 = vmatpush3.bf16.msra.mxu1 %v1592_v34 }
 0x655   : > { %1517 = vmatprep.subr.bf16.mxu1 %v1682_v8 }
 0x658   : > { %1518 = vmatpush3.bf16.msra.mxu1 %v1593_v35 }
 0x659   : > { %1519 = vmatprep.subr.bf16.mxu1 %v1682_v8 }
 0x65c   : > { %1520 = vmatpush3.bf16.msra.mxu1 %v1594_v36 }
 0x65d   : > { %1521 = vmatprep.subr.bf16.mxu1 %v1682_v8 }
 0x660   : > { %1522 = vmatpush3.bf16.msra.mxu1 %v1595_v37 }
 0x716   : > { %v1059_v6 = vpop.f32.mrb[12].mxu1 }
 0x717   : > { %v1060_v7 = vadd.f32 %v1378_v5, %v1059_v6  ;;  %v1497_v9 = vpop.f32.mrb[13].mxu1 }
 0x718   : > { %v1062_v10 = vpop.f32.mrb[14].mxu1 }
 0x719   : > { %v1932_v11 = vadd.f32 %v1060_v7, %v1822_v0  ;;  %v1498_v12 = vpop.f32.mrb[15].mxu1  ;;  %v1587_v0 = vld [vmem:[%s2047_s9 + $0x8] sm:$0xff]  }
 0x71a   : > { %1502 = vmatpush3.bf16.msra.mxu0 %v1587_v0 }
 0x71b   : > { %v1068_v13 = vsel %vm440_vm0, %v1932_v11, 0.0 }
 0x71c   : > { %1069 = vadd.xlane.f32.xlu1 %v1068_v13 }
 0x7a9   : > { %v1070_v14 = vpop.xlane.xlu1 %1069 }
 0x7aa   : > { %v1071_v15 = vmul.f32 0.03125, %v1070_v14 }
 0x7ac   : > { %v1072_v16 = vsub.f32 %v1932_v11, %v1071_v15 }
 0x7ae   : > { %v1073_v17 = vmul.f32 %v1072_v16, %v1072_v16 }
 0x7b0   : > { %v1074_v18 = vsel %vm440_vm0, %v1073_v17, 0.0 }
 0x7b1   : > { %1075 = vadd.xlane.f32.xlu0 %v1074_v18 }
 0x83e   : > { %v1076_v21 = vpop.xlane.xlu0 %1075 }
 0x83f   : > { %v1077_v22 = vmul.f32 0.03125, %v1076_v21 }
 0x841   : > { %v1078_v23 = vadd.f32 1e-06, %v1077_v22 }
 0x843   : > { %1614 = vrsqrt.f32 %v1078_v23 }
 0x84d   : > { %v1615_v24 = vpop.eup %1614 }
 0x84e   : > { %v1080_v26 = vmul.f32 %v1615_v24, %v1072_v16 }
 0x850   : > { %v1087_v28 = vmul.f32 %v1382_v25, %v1080_v26 }
 0x852   : > { %v1094_v29 = vadd.f32 %v1383_v27, %v1087_v28 }
 0x854   : > { %v1095_v30 = vpack.c.bf16 %v1094_v29, %v1094_v29 }
 0x856   : > { %1504 = vmatmul.mubr.msk.bf16.vlgmr.msra.gmra.mrb[24].mxu0 %vm440_vm0, %v1095_v30 }
 0x929   : > { %v1156_v39 = vpop.f32.mrb[24].mxu0 }
 0x92a   : > { %v1157_v40 = vadd.f32 %v1384_v38, %v1156_v39  ;;  %v1505_v41 = vpop.f32.mrb[25].mxu0 }
 0x92b   : > { %v1159_v42 = vpop.f32.mrb[26].mxu0 }
 0x92c   : > { %v1163_v43 = vmul.f32 0.044715, %v1157_v40  ;;  %v1506_v44 = vpop.f32.mrb[27].mxu0  ;;  %v1162_v8 = vmul.f32 0.5, %v1157_v40 }
 0x92e   : > { %v1164_v45 = vmul.f32 %v1163_v43, %v1157_v40 }
 0x930   : > { %v1165_v46 = vmul.f32 %v1164_v45, %v1157_v40 }
 0x932   : > { %v1166_v47 = vadd.f32 %v1165_v46, %v1157_v40 }
 0x934   : > { %v1167_v48 = vmul.f32 0.7978846, %v1166_v47 }
 0x936   : > { %1616 = vtanh.f32 %v1167_v48 }
 0x940   : > { %v1617_v49 = vpop.eup %1616 }
 0x941   : > { %v1169_v50 = vadd.f32 1.0, %v1617_v49 }
 0x943   : > { %v1170_v51 = vmul.f32 %v1169_v50, %v1162_v8 }
 0x945   : > { %v1171_v52 = vpack.c.bf16 %v1170_v51, %v1170_v51 }
 0x947   : > { %1524 = vmatmul.mubr.bf16.vlgmr.msra.gmra.mrb[16].mxu1 %v1171_v52 }
 0xa1a   : > { %v1277_v54 = vpop.f32.mrb[16].mxu1 }
 0xa1b   : > { %v1278_v55 = vadd.f32 %v1388_v53, %v1277_v54  ;;  %v1525_v56 = vpop.f32.mrb[17].mxu1 }
 0xa1c   : > { %v1280_v57 = vpop.f32.mrb[18].mxu1 }
 0xa1d   : > { %v1283_v58 = vadd.f32 %v1278_v55, %v1932_v11  ;;  %v1526_v59 = vpop.f32.mrb[19].mxu1 }
 0xa1f   : > { %1284 = vst.msk [vmem:[%s431_s22] sm:$0xff] %vm440_vm0, %v1283_v58 }
 0xa20   : > { %1631 = shalt.err (!%p1628_p3)
}
 0xa21   : > { %s1632_s0 = scalar_lea.hbm %s1995_s1, 128  ;;  %s1636_s22 = scalar_lea.hbm %s2051_s13, 256 }
 0xa22   : > { %p1633_p4 = scmp.ne.s32.totalorder %s1995_s1, %s1632_s0  ;;  %p1637_p9 = scmp.lt.u32.totalorder %s1995_s1, %s2051_s13 }
 0xa23   : > { %p1638_p10 = scmp.lt.u32.totalorder %s1636_s22, %s1632_s0  ;;  %p1640_p12 = scmp.lt.u32.totalorder %s1632_s0, %s1995_s1 }
 0xa24   : > { %p1634_p7 = pnand %p1633_p4, %p1807_p5 }
 0xa25   : > { %p1639_p11 = por %p1638_p10, %p1637_p9 }
 0xa26   : > { %p1635_p8 = pneg %p1634_p7 }
 0xa27   : > { %p1641_p13 = por %p1640_p12, %p1639_p11 }
 0xa29   : > { %p1642_p0 = pnand %p1641_p13, %p1635_p8 }
 0xa2b   : > { %1645 = shalt.err (!%p1642_p0)
}
 0xa2c   : > { %1527 = dma.vmem_to_hbm [thread:$0]  (%p1807_p5), %s1997_s23, 128, %s1995_s1, %s1286_s29  }
 0xa2d PF: > { %p1533_p1 = scmp.ge.s32.totalorder %s1680_s28, 2  ;;  %s1311_s2 = sand.u32 1, %s1668_s25  }
 0xa2e   : > { %s1312_s15 = scalar_lea.sflag [#allocation3], %s1311_s2 }
 0xa2f   : > { %p1530_p2 = pnand %p1533_p1, %p1811_p6 }
 0xa31   : > { %1663 = dma.done.wait (!%p1530_p2), %s1312_s15, 128  }
 0xa32   : > { %1665 = vsyncadd (!%p1530_p2), %s1312_s15, 4294967168  ;;  %p23_p3 = scmp.ge.s32.totalorder %s1794_s14, 4   ;;  %s2060_s25 = smov %s1672_s26 }
 0xa33   : > { %s2061_s26 = smov %s1676_s27  ;;  %s2062_s27 = smov %s1805_s17 }
 0xa34   : > { %s2063_s28 = smov %s1794_s14  ;;  %25 = sbr.rel (!%p23_p3) target bundleno = 7 (0x7), region = 107 }
 0xa3b   :  { %1317 = vsyncpa [#allocation3], 1 }
 0xa3c   :  { %1319 = vsyncpa [#allocation3 + $0x1], 1 }

</bundles_post_ra>
